<compile_context>
chip_gen: v6e
topology: v6e:2x2x1
jax: 0.10.0
libtpu: 0.0.40
codegen_flags: <defaults>
</compile_context>

<pallas_src>
import functools
import math

import numpy as np
import jax
import jax.numpy as jnp
from jax.experimental import pallas as pl
from jax.experimental.pallas import tpu as pltpu

LANES = 128  # lane-dense padding target for the small fc dimensions


# ----------------------------- Fused Pallas kernel --------------------------- #
def _critic_kernel(xs_ref, act_ref, xyz_ref,
                   w1_ref, b1_ref, w2_ref, b2_ref,
                   w1c_ref, w1a_ref, bf1_ref,
                   w2h_ref, w2x_ref, bf2_ref,
                   w3_ref, b3_ref, o_ref):
    f32 = jnp.float32
    dot = functools.partial(jnp.dot, preferred_element_type=f32)

    # ---- conv1 (4x4 / stride 2) == 2x2 / stride 1 conv over the space-to-depth
    #      input, expressed as two banded matmuls (one per row shift u). --------
    a1 = xs_ref[0]                                   # (H/2, (W/2)*4C) = (8, 96)
    oh1 = a1.shape[0] - 1                            # 7
    z1 = dot(a1[0:oh1, :], w1_ref[0]) + dot(a1[1:oh1 + 1, :], w1_ref[1])
    a2 = jnp.maximum(z1 + b1_ref[...], 0.0)          # (7, 7*32) ReLU(conv1)

    # ---- conv2 (2x2 / stride 1), same banded trick. ---------------------------
    oh2 = oh1 - 1                                    # 6
    z2 = dot(a2[0:oh2, :], w2_ref[0]) + dot(a2[1:oh2 + 1, :], w2_ref[1])
    a3 = jnp.maximum(z2 + b2_ref[...], 0.0)          # (6, 6*64) ReLU(conv2)

    # ---- fc1: conv features (per output row) + action, no concatenate. --------
    h1 = dot(act_ref[0], w1a_ref[...])               # (1, 128)
    for y in range(oh2):
        h1 = h1 + dot(a3[y:y + 1, :], w1c_ref[y])
    h1 = jnp.maximum(h1 + bf1_ref[...], 0.0)         # (1, 128), cols >= 32 are 0

    # ---- fc2: hidden + xyz, no concatenate. -----------------------------------
    h2 = dot(h1, w2h_ref[...]) + dot(xyz_ref[0], w2x_ref[...]) + bf2_ref[...]
    h2 = jnp.maximum(h2, 0.0)                        # (1, 128), cols >= 34 are 0

    # ---- fc3: q lands in lane 0 of a 128-wide slab (lane-dense final store). --
    o_ref[0] = dot(h2, w3_ref[...]) + b3_ref[...]


# --------------------------- Parameter construction --------------------------- #
def init_params(key, input_dims, action_size, hidden_size=32,
                num_rel_positions=2, init_w=0.003):
    C = input_dims[0] - 1
    H, W = input_dims[1], input_dims[2]
    oh1, ow1 = (H - 4) // 2 + 1, (W - 4) // 2 + 1       # conv1: k=4, s=2
    oh2, ow2 = oh1 - 1, ow1 - 1                         # conv2: k=2, s=1
    fc_input_dims = 64 * oh2 * ow2

    keys = jax.random.split(key, 10)

    def u(k, shape, lim):
        return jax.random.uniform(k, shape, jnp.float32, -lim, lim)

    h2 = hidden_size + num_rel_positions
    params = {
        "conv1_w": u(keys[0], (32, C, 4, 4), 1.0 / math.sqrt(C * 16)),
        "conv1_b": u(keys[1], (32,), 1.0 / math.sqrt(C * 16)),
        "conv2_w": u(keys[2], (64, 32, 2, 2), 1.0 / math.sqrt(32 * 4)),
        "conv2_b": u(keys[3], (64,), 1.0 / math.sqrt(32 * 4)),
        # hidden_init uses weight.size()[0] (== out_features) as "fan_in"
        "fc1_w": u(keys[4], (hidden_size, fc_input_dims + action_size),
                   1.0 / math.sqrt(hidden_size)),
        "fc1_b": u(keys[5], (hidden_size,), 1.0 / math.sqrt(fc_input_dims + action_size)),
        "fc2_w": u(keys[6], (h2, h2), 1.0 / math.sqrt(h2)),
        "fc2_b": u(keys[7], (h2,), 1.0 / math.sqrt(h2)),
        "fc3_w": u(keys[8], (1, h2), init_w),
        "fc3_b": u(keys[9], (1,), init_w),
    }
    return params


def prepare_params(p, input_dims):
    """ONE-TIME re-layout of PyTorch-style params into the MXU-friendly layouts
    the fused kernel consumes (pre-transpose / pre-pad once, not per call)."""
    C = input_dims[0] - 1
    H, W = input_dims[1], input_dims[2]
    oh1, ow1 = (H - 4) // 2 + 1, (W - 4) // 2 + 1
    oh2, ow2 = oh1 - 1, ow1 - 1

    w1 = np.asarray(p["conv1_w"], np.float32)          # (32, C, 4, 4)
    b1 = np.asarray(p["conv1_b"], np.float32)
    w2 = np.asarray(p["conv2_w"], np.float32)          # (64, 32, 2, 2)
    b2 = np.asarray(p["conv2_b"], np.float32)
    fc1w = np.asarray(p["fc1_w"], np.float32)          # (32, 2304 + A)
    fc1b = np.asarray(p["fc1_b"], np.float32)
    fc2w = np.asarray(p["fc2_w"], np.float32)          # (34, 34)
    fc2b = np.asarray(p["fc2_b"], np.float32)
    fc3w = np.asarray(p["fc3_w"], np.float32)          # (1, 34)
    fc3b = np.asarray(p["fc3_b"], np.float32)

    c1out, c2out = w1.shape[0], w2.shape[0]
    hidden = fc1w.shape[0]
    h2dim = fc2w.shape[0]
    cs = 4 * C                                         # space-to-depth channels
    ws2d = W // 2

    # conv1 taps in s2d space: w1s[u, v][(dy*2+dx)*C + c, co] = w1[co, c, 2u+dy, 2v+dx]
    w1r = w1.reshape(c1out, C, 2, 2, 2, 2)             # (co, c, u, dy, v, dx)
    w1s = w1r.transpose(2, 4, 3, 5, 1, 0).reshape(2, 2, cs, c1out)
    w1band = np.zeros((2, ws2d * cs, ow1 * c1out), np.float32)
    for u in range(2):
        for v in range(2):
            for x in range(ow1):
                w1band[u, (x + v) * cs:(x + v + 1) * cs,
                       x * c1out:(x + 1) * c1out] += w1s[u, v]
    b1t = np.tile(b1, ow1).reshape(1, ow1 * c1out)

    # conv2 taps: w2s[u, v][cin, cout] = w2[cout, cin, u, v]
    w2s = w2.transpose(2, 3, 1, 0)
    w2band = np.zeros((2, ow1 * c1out, ow2 * c2out), np.float32)
    for u in range(2):
        for v in range(2):
            for x in range(ow2):
                w2band[u, (x + v) * c1out:(x + v + 1) * c1out,
                       x * c2out:(x + 1) * c2out] += w2s[u, v]
    b2t = np.tile(b2, ow2).reshape(1, ow2 * c2out)

    # fc1: conv part permuted to the kernel's (y, x*c2out + co) layout, one
    # (ow2*c2out, LANES) slab per output row y, plus the action part.
    # Zero-padded output lanes get zero weight + zero bias -> ReLU keeps them 0.
    conv_feat = c2out * oh2 * ow2
    asz = fc1w.shape[1] - conv_feat
    wc = fc1w[:, :conv_feat].reshape(hidden, c2out, oh2, ow2)
    wc = wc.transpose(2, 3, 1, 0).reshape(oh2, ow2 * c2out, hidden)
    w1c = np.zeros((oh2, ow2 * c2out, LANES), np.float32)
    w1c[:, :, :hidden] = wc
    w1a = np.zeros((LANES, LANES), np.float32)
    w1a[:asz, :hidden] = fc1w[:, conv_feat:].T
    bf1 = np.zeros((1, LANES), np.float32)
    bf1[0, :hidden] = fc1b

    # fc2: split hidden part / xyz part, both zero-padded to 128x128.
    w2h = np.zeros((LANES, LANES), np.float32)
    w2h[:hidden, :h2dim] = fc2w[:, :hidden].T
    w2x = np.zeros((LANES, LANES), np.float32)
    w2x[:h2dim - hidden, :h2dim] = fc2w[:, hidden:].T
    bf2 = np.zeros((1, LANES), np.float32)
    bf2[0, :h2dim] = fc2b

    # fc3: real q in lane 0 of a 128-wide slab.
    w3 = np.zeros((LANES, LANES), np.float32)
    w3[:h2dim, 0] = fc3w[0, :]
    b3 = np.zeros((1, LANES), np.float32)
    b3[0, 0] = fc3b[0]

    prep = dict(w1band=w1band, b1t=b1t, w2band=w2band, b2t=b2t,
                w1c=w1c, w1a=w1a, bf1=bf1,
                w2h=w2h, w2x=w2x, bf2=bf2, w3=w3, b3=b3)
    return {k: jnp.asarray(v) for k, v in prep.items()}


# ------------------------------ Forward passes -------------------------------- #
def critic_forward(prep, state, action):
    state = state.astype(jnp.float32)
    action = action.astype(jnp.float32)
    B = state.shape[0]

    # Tiny input-side glue only (no im2col loops, no inter-layer HBM traffic).
    img = jnp.transpose(state[:, :-1, :, :], (0, 2, 3, 1))      # (B, H, W, C) NHWC
    _, H, W, C = img.shape
    xs2d = img.reshape(B, H // 2, 2, W // 2, 2, C)
    xs2d = xs2d.transpose(0, 1, 3, 2, 4, 5).reshape(B, H // 2, (W // 2) * 4 * C)

    xyz = jnp.stack([state[:, -1, 0, 0], state[:, -1, 0, 1]], axis=-1)  # (B, 2)
    act_p = jnp.pad(action, ((0, 0), (0, LANES - action.shape[1])))[:, None, :]
    xyz_p = jnp.pad(xyz, ((0, 0), (0, LANES - xyz.shape[1])))[:, None, :]

    hs2d, ws_cs = xs2d.shape[1], xs2d.shape[2]

    out = pl.pallas_call(
        _critic_kernel,
        out_shape=jax.ShapeDtypeStruct((B, 1, LANES), jnp.float32),
        grid=(B,),
        in_specs=[
            # per-batch activations / small vectors
            pl.BlockSpec((1, hs2d, ws_cs), lambda b: (b, 0, 0)),
            pl.BlockSpec((1, 1, LANES), lambda b: (b, 0, 0)),
            pl.BlockSpec((1, 1, LANES), lambda b: (b, 0, 0)),
            # VMEM-resident weights (constant block index across the grid)
            pl.BlockSpec(prep["w1band"].shape, lambda b: (0, 0, 0)),
            pl.BlockSpec(prep["b1t"].shape, lambda b: (0, 0)),
            pl.BlockSpec(prep["w2band"].shape, lambda b: (0, 0, 0)),
            pl.BlockSpec(prep["b2t"].shape, lambda b: (0, 0)),
            pl.BlockSpec(prep["w1c"].shape, lambda b: (0, 0, 0)),
            pl.BlockSpec(prep["w1a"].shape, lambda b: (0, 0)),
            pl.BlockSpec(prep["bf1"].shape, lambda b: (0, 0)),
            pl.BlockSpec(prep["w2h"].shape, lambda b: (0, 0)),
            pl.BlockSpec(prep["w2x"].shape, lambda b: (0, 0)),
            pl.BlockSpec(prep["bf2"].shape, lambda b: (0, 0)),
            pl.BlockSpec(prep["w3"].shape, lambda b: (0, 0)),
            pl.BlockSpec(prep["b3"].shape, lambda b: (0, 0)),
        ],
        out_specs=pl.BlockSpec((1, 1, LANES), lambda b: (b, 0, 0)),
        compiler_params=pltpu.CompilerParams(
            dimension_semantics=("parallel",)),
    )(xs2d, act_p, xyz_p,
      prep["w1band"], prep["b1t"], prep["w2band"], prep["b2t"],
      prep["w1c"], prep["w1a"], prep["bf1"],
      prep["w2h"], prep["w2x"], prep["bf2"],
      prep["w3"], prep["b3"])

    return out[:, 0, :1]     # (B, 1); lanes 1..127 of the padded slab are zero


def reference_forward(params, state, action):
    """Pure-JAX reference (XLA convs + matmuls) for correctness checking."""
    state = state.astype(jnp.float32)
    action = action.astype(jnp.float32)
    image_state = state[:, 0:-1, :, :]
    dn = ("NCHW", "OIHW", "NCHW")
    c1 = jax.nn.relu(
        jax.lax.conv_general_dilated(image_state, params["conv1_w"], (2, 2), "VALID",
                                     dimension_numbers=dn)
        + params["conv1_b"][None, :, None, None])
    c2 = jax.nn.relu(
        jax.lax.conv_general_dilated(c1, params["conv2_w"], (1, 1), "VALID",
                                     dimension_numbers=dn)
        + params["conv2_b"][None, :, None, None])
    B = c2.shape[0]
    conv_state = c2.reshape(B, -1)
    combined = jnp.concatenate([conv_state, action], axis=1)
    flat1 = jax.nn.relu(combined @ params["fc1_w"].T + params["fc1_b"])
    xyz_state = jnp.stack([state[:, -1, 0, 0], state[:, -1, 0, 1]], axis=-1)
    cat = jnp.concatenate([flat1, xyz_state], axis=1)
    flat2 = jax.nn.relu(cat @ params["fc2_w"].T + params["fc2_b"])
    return flat2 @ params["fc3_w"].T + params["fc3_b"]


# ----------------------------------- Main -------------------------------------- #
if __name__ == "__main__":
    B = 2
    input_dims = (4, 16, 16)   # (channels incl. rel-position plane, H, W)
    action_size = 4

    key = jax.random.PRNGKey(0)
    k_params, k_state, k_action = jax.random.split(key, 3)

    params = init_params(k_params, input_dims, action_size)
    prep = prepare_params(params, input_dims)     # one-time weight re-layout

    state = jax.random.normal(k_state, (B,) + input_dims, jnp.float32)
    action = jax.random.normal(k_action, (B, action_size), jnp.float32)

    fwd = jax.jit(critic_forward)
    q = jax.block_until_ready(fwd(prep, state, action))
    q_ref = jax.block_until_ready(reference_forward(params, state, action))

    assert q.shape == (B, 1), q.shape
    assert jnp.allclose(q, q_ref, atol=1e-3, rtol=1e-3), (q, q_ref)
    print("KERNEL_OK")
</pallas_src>

<mosaic_0001>
module attributes {stable_mosaic.version = 11 : i64} {
  func.func @_critic_kernel(%arg0: i32, %arg1: memref<1x8x96xf32, #tpu.memory_space<vmem>>, %arg2: memref<1x1x128xf32, #tpu.memory_space<vmem>>, %arg3: memref<1x1x128xf32, #tpu.memory_space<vmem>>, %arg4: memref<2x96x224xf32, #tpu.memory_space<vmem>>, %arg5: memref<1x224xf32, #tpu.memory_space<vmem>>, %arg6: memref<2x224x384xf32, #tpu.memory_space<vmem>>, %arg7: memref<1x384xf32, #tpu.memory_space<vmem>>, %arg8: memref<6x384x128xf32, #tpu.memory_space<vmem>>, %arg9: memref<128x128xf32, #tpu.memory_space<vmem>>, %arg10: memref<1x128xf32, #tpu.memory_space<vmem>>, %arg11: memref<128x128xf32, #tpu.memory_space<vmem>>, %arg12: memref<128x128xf32, #tpu.memory_space<vmem>>, %arg13: memref<1x128xf32, #tpu.memory_space<vmem>>, %arg14: memref<128x128xf32, #tpu.memory_space<vmem>>, %arg15: memref<1x128xf32, #tpu.memory_space<vmem>>, %arg16: memref<1x1x128xf32, #tpu.memory_space<vmem>>) attributes {dimension_semantics = [#tpu.dimension_semantics<parallel>], iteration_bounds = array<i64: 2>, scalar_prefetch = 0 : i64, scratch_operands = 0 : i64, tpu.core_type = #tpu.core_type<tc>, window_params = [{transform_indices = @transform_0, window_bounds = array<i64: 1, 8, 96>}, {transform_indices = @transform_1, window_bounds = array<i64: 1, 1, 128>}, {transform_indices = @transform_2, window_bounds = array<i64: 1, 1, 128>}, {pipeline_mode = #tpu.pipeline_mode<synchronous>, transform_indices = @transform_3, window_bounds = array<i64: 2, 96, 224>}, {pipeline_mode = #tpu.pipeline_mode<synchronous>, transform_indices = @transform_4, window_bounds = array<i64: 1, 224>}, {pipeline_mode = #tpu.pipeline_mode<synchronous>, transform_indices = @transform_5, window_bounds = array<i64: 2, 224, 384>}, {pipeline_mode = #tpu.pipeline_mode<synchronous>, transform_indices = @transform_6, window_bounds = array<i64: 1, 384>}, {pipeline_mode = #tpu.pipeline_mode<synchronous>, transform_indices = @transform_7, window_bounds = array<i64: 6, 384, 128>}, {pipeline_mode = #tpu.pipeline_mode<synchronous>, transform_indices = @transform_8, window_bounds = array<i64: 128, 128>}, {pipeline_mode = #tpu.pipeline_mode<synchronous>, transform_indices = @transform_9, window_bounds = array<i64: 1, 128>}, {pipeline_mode = #tpu.pipeline_mode<synchronous>, transform_indices = @transform_10, window_bounds = array<i64: 128, 128>}, {pipeline_mode = #tpu.pipeline_mode<synchronous>, transform_indices = @transform_11, window_bounds = array<i64: 128, 128>}, {pipeline_mode = #tpu.pipeline_mode<synchronous>, transform_indices = @transform_12, window_bounds = array<i64: 1, 128>}, {pipeline_mode = #tpu.pipeline_mode<synchronous>, transform_indices = @transform_13, window_bounds = array<i64: 128, 128>}, {pipeline_mode = #tpu.pipeline_mode<synchronous>, transform_indices = @transform_14, window_bounds = array<i64: 1, 128>}, {transform_indices = @transform_15, window_bounds = array<i64: 1, 1, 128>}]} {
    %c0 = arith.constant 0 : index
    %c0_0 = arith.constant 0 : index
    %c0_1 = arith.constant 0 : index
    %0 = vector.load %arg1[%c0, %c0_0, %c0_1] : memref<1x8x96xf32, #tpu.memory_space<vmem>>, vector<1x8x96xf32>
    %1 = vector.shape_cast %0 : vector<1x8x96xf32> to vector<8x96xf32>
    %2 = vector.extract_strided_slice %1 {offsets = [0, 0], sizes = [7, 96], strides = [1, 1]} : vector<8x96xf32> to vector<7x96xf32>
    %c0_2 = arith.constant 0 : index
    %c0_3 = arith.constant 0 : index
    %c0_4 = arith.constant 0 : index
    %3 = vector.load %arg4[%c0_2, %c0_3, %c0_4] : memref<2x96x224xf32, #tpu.memory_space<vmem>>, vector<1x96x224xf32>
    %4 = vector.shape_cast %3 : vector<1x96x224xf32> to vector<96x224xf32>
    %cst = arith.constant dense<0.000000e+00> : vector<7x224xf32>
    %5 = tpu.matmul %2, %4, %cst {dimension_numbers = #tpu.dot_dimension_numbers<[1], [0], [0], [1], [0, 0, 1, 1], [], []>} : vector<7x96xf32>, vector<96x224xf32>, vector<7x224xf32> -> vector<7x224xf32>
    %6 = vector.extract_strided_slice %1 {offsets = [1, 0], sizes = [7, 96], strides = [1, 1]} : vector<8x96xf32> to vector<7x96xf32>
    %c1 = arith.constant 1 : index
    %c0_5 = arith.constant 0 : index
    %c0_6 = arith.constant 0 : index
    %7 = vector.load %arg4[%c1, %c0_5, %c0_6] : memref<2x96x224xf32, #tpu.memory_space<vmem>>, vector<1x96x224xf32>
    %8 = vector.shape_cast %7 : vector<1x96x224xf32> to vector<96x224xf32>
    %cst_7 = arith.constant dense<0.000000e+00> : vector<7x224xf32>
    %9 = tpu.matmul %6, %8, %cst_7 {dimension_numbers = #tpu.dot_dimension_numbers<[1], [0], [0], [1], [0, 0, 1, 1], [], []>} : vector<7x96xf32>, vector<96x224xf32>, vector<7x224xf32> -> vector<7x224xf32>
    %10 = arith.addf %5, %9 : vector<7x224xf32>
    %c0_8 = arith.constant 0 : index
    %c0_9 = arith.constant 0 : index
    %11 = vector.load %arg5[%c0_8, %c0_9] : memref<1x224xf32, #tpu.memory_space<vmem>>, vector<1x224xf32>
    %12 = vector.broadcast %11 : vector<1x224xf32> to vector<7x224xf32>
    %13 = arith.addf %10, %12 : vector<7x224xf32>
    %cst_10 = arith.constant 0.000000e+00 : f32
    %14 = vector.broadcast %cst_10 : f32 to vector<7x224xf32>
    %15 = arith.maximumf %13, %14 : vector<7x224xf32>
    %16 = vector.extract_strided_slice %15 {offsets = [0, 0], sizes = [6, 224], strides = [1, 1]} : vector<7x224xf32> to vector<6x224xf32>
    %c0_11 = arith.constant 0 : index
    %c0_12 = arith.constant 0 : index
    %c0_13 = arith.constant 0 : index
    %17 = vector.load %arg6[%c0_11, %c0_12, %c0_13] : memref<2x224x384xf32, #tpu.memory_space<vmem>>, vector<1x224x384xf32>
    %18 = vector.shape_cast %17 : vector<1x224x384xf32> to vector<224x384xf32>
    %cst_14 = arith.constant dense<0.000000e+00> : vector<6x384xf32>
    %19 = tpu.matmul %16, %18, %cst_14 {dimension_numbers = #tpu.dot_dimension_numbers<[1], [0], [0], [1], [0, 0, 1, 1], [], []>} : vector<6x224xf32>, vector<224x384xf32>, vector<6x384xf32> -> vector<6x384xf32>
    %20 = vector.extract_strided_slice %15 {offsets = [1, 0], sizes = [6, 224], strides = [1, 1]} : vector<7x224xf32> to vector<6x224xf32>
    %c1_15 = arith.constant 1 : index
    %c0_16 = arith.constant 0 : index
    %c0_17 = arith.constant 0 : index
    %21 = vector.load %arg6[%c1_15, %c0_16, %c0_17] : memref<2x224x384xf32, #tpu.memory_space<vmem>>, vector<1x224x384xf32>
    %22 = vector.shape_cast %21 : vector<1x224x384xf32> to vector<224x384xf32>
    %cst_18 = arith.constant dense<0.000000e+00> : vector<6x384xf32>
    %23 = tpu.matmul %20, %22, %cst_18 {dimension_numbers = #tpu.dot_dimension_numbers<[1], [0], [0], [1], [0, 0, 1, 1], [], []>} : vector<6x224xf32>, vector<224x384xf32>, vector<6x384xf32> -> vector<6x384xf32>
    %24 = arith.addf %19, %23 : vector<6x384xf32>
    %c0_19 = arith.constant 0 : index
    %c0_20 = arith.constant 0 : index
    %25 = vector.load %arg7[%c0_19, %c0_20] : memref<1x384xf32, #tpu.memory_space<vmem>>, vector<1x384xf32>
    %26 = vector.broadcast %25 : vector<1x384xf32> to vector<6x384xf32>
    %27 = arith.addf %24, %26 : vector<6x384xf32>
    %cst_21 = arith.constant 0.000000e+00 : f32
    %28 = vector.broadcast %cst_21 : f32 to vector<6x384xf32>
    %29 = arith.maximumf %27, %28 : vector<6x384xf32>
    %c0_22 = arith.constant 0 : index
    %c0_23 = arith.constant 0 : index
    %c0_24 = arith.constant 0 : index
    %30 = vector.load %arg2[%c0_22, %c0_23, %c0_24] : memref<1x1x128xf32, #tpu.memory_space<vmem>>, vector<1x1x128xf32>
    %31 = vector.shape_cast %30 : vector<1x1x128xf32> to vector<1x128xf32>
    %c0_25 = arith.constant 0 : index
    %c0_26 = arith.constant 0 : index
    %32 = vector.load %arg9[%c0_25, %c0_26] : memref<128x128xf32, #tpu.memory_space<vmem>>, vector<128x128xf32>
    %cst_27 = arith.constant dense<0.000000e+00> : vector<1x128xf32>
    %33 = tpu.matmul %31, %32, %cst_27 {dimension_numbers = #tpu.dot_dimension_numbers<[1], [0], [0], [1], [0, 0, 1, 1], [], []>} : vector<1x128xf32>, vector<128x128xf32>, vector<1x128xf32> -> vector<1x128xf32>
    %34 = vector.extract_strided_slice %29 {offsets = [0, 0], sizes = [1, 384], strides = [1, 1]} : vector<6x384xf32> to vector<1x384xf32>
    %c0_28 = arith.constant 0 : index
    %c0_29 = arith.constant 0 : index
    %c0_30 = arith.constant 0 : index
    %35 = vector.load %arg8[%c0_28, %c0_29, %c0_30] : memref<6x384x128xf32, #tpu.memory_space<vmem>>, vector<1x384x128xf32>
    %36 = vector.shape_cast %35 : vector<1x384x128xf32> to vector<384x128xf32>
    %cst_31 = arith.constant dense<0.000000e+00> : vector<1x128xf32>
    %37 = tpu.matmul %34, %36, %cst_31 {dimension_numbers = #tpu.dot_dimension_numbers<[1], [0], [0], [1], [0, 0, 1, 1], [], []>} : vector<1x384xf32>, vector<384x128xf32>, vector<1x128xf32> -> vector<1x128xf32>
    %38 = arith.addf %33, %37 : vector<1x128xf32>
    %39 = vector.extract_strided_slice %29 {offsets = [1, 0], sizes = [1, 384], strides = [1, 1]} : vector<6x384xf32> to vector<1x384xf32>
    %c1_32 = arith.constant 1 : index
    %c0_33 = arith.constant 0 : index
    %c0_34 = arith.constant 0 : index
    %40 = vector.load %arg8[%c1_32, %c0_33, %c0_34] : memref<6x384x128xf32, #tpu.memory_space<vmem>>, vector<1x384x128xf32>
    %41 = vector.shape_cast %40 : vector<1x384x128xf32> to vector<384x128xf32>
    %cst_35 = arith.constant dense<0.000000e+00> : vector<1x128xf32>
    %42 = tpu.matmul %39, %41, %cst_35 {dimension_numbers = #tpu.dot_dimension_numbers<[1], [0], [0], [1], [0, 0, 1, 1], [], []>} : vector<1x384xf32>, vector<384x128xf32>, vector<1x128xf32> -> vector<1x128xf32>
    %43 = arith.addf %38, %42 : vector<1x128xf32>
    %44 = vector.extract_strided_slice %29 {offsets = [2, 0], sizes = [1, 384], strides = [1, 1]} : vector<6x384xf32> to vector<1x384xf32>
    %c2 = arith.constant 2 : index
    %c0_36 = arith.constant 0 : index
    %c0_37 = arith.constant 0 : index
    %45 = vector.load %arg8[%c2, %c0_36, %c0_37] : memref<6x384x128xf32, #tpu.memory_space<vmem>>, vector<1x384x128xf32>
    %46 = vector.shape_cast %45 : vector<1x384x128xf32> to vector<384x128xf32>
    %cst_38 = arith.constant dense<0.000000e+00> : vector<1x128xf32>
    %47 = tpu.matmul %44, %46, %cst_38 {dimension_numbers = #tpu.dot_dimension_numbers<[1], [0], [0], [1], [0, 0, 1, 1], [], []>} : vector<1x384xf32>, vector<384x128xf32>, vector<1x128xf32> -> vector<1x128xf32>
    %48 = arith.addf %43, %47 : vector<1x128xf32>
    %49 = vector.extract_strided_slice %29 {offsets = [3, 0], sizes = [1, 384], strides = [1, 1]} : vector<6x384xf32> to vector<1x384xf32>
    %c3 = arith.constant 3 : index
    %c0_39 = arith.constant 0 : index
    %c0_40 = arith.constant 0 : index
    %50 = vector.load %arg8[%c3, %c0_39, %c0_40] : memref<6x384x128xf32, #tpu.memory_space<vmem>>, vector<1x384x128xf32>
    %51 = vector.shape_cast %50 : vector<1x384x128xf32> to vector<384x128xf32>
    %cst_41 = arith.constant dense<0.000000e+00> : vector<1x128xf32>
    %52 = tpu.matmul %49, %51, %cst_41 {dimension_numbers = #tpu.dot_dimension_numbers<[1], [0], [0], [1], [0, 0, 1, 1], [], []>} : vector<1x384xf32>, vector<384x128xf32>, vector<1x128xf32> -> vector<1x128xf32>
    %53 = arith.addf %48, %52 : vector<1x128xf32>
    %54 = vector.extract_strided_slice %29 {offsets = [4, 0], sizes = [1, 384], strides = [1, 1]} : vector<6x384xf32> to vector<1x384xf32>
    %c4 = arith.constant 4 : index
    %c0_42 = arith.constant 0 : index
    %c0_43 = arith.constant 0 : index
    %55 = vector.load %arg8[%c4, %c0_42, %c0_43] : memref<6x384x128xf32, #tpu.memory_space<vmem>>, vector<1x384x128xf32>
    %56 = vector.shape_cast %55 : vector<1x384x128xf32> to vector<384x128xf32>
    %cst_44 = arith.constant dense<0.000000e+00> : vector<1x128xf32>
    %57 = tpu.matmul %54, %56, %cst_44 {dimension_numbers = #tpu.dot_dimension_numbers<[1], [0], [0], [1], [0, 0, 1, 1], [], []>} : vector<1x384xf32>, vector<384x128xf32>, vector<1x128xf32> -> vector<1x128xf32>
    %58 = arith.addf %53, %57 : vector<1x128xf32>
    %59 = vector.extract_strided_slice %29 {offsets = [5, 0], sizes = [1, 384], strides = [1, 1]} : vector<6x384xf32> to vector<1x384xf32>
    %c5 = arith.constant 5 : index
    %c0_45 = arith.constant 0 : index
    %c0_46 = arith.constant 0 : index
    %60 = vector.load %arg8[%c5, %c0_45, %c0_46] : memref<6x384x128xf32, #tpu.memory_space<vmem>>, vector<1x384x128xf32>
    %61 = vector.shape_cast %60 : vector<1x384x128xf32> to vector<384x128xf32>
    %cst_47 = arith.constant dense<0.000000e+00> : vector<1x128xf32>
    %62 = tpu.matmul %59, %61, %cst_47 {dimension_numbers = #tpu.dot_dimension_numbers<[1], [0], [0], [1], [0, 0, 1, 1], [], []>} : vector<1x384xf32>, vector<384x128xf32>, vector<1x128xf32> -> vector<1x128xf32>
    %63 = arith.addf %58, %62 : vector<1x128xf32>
    %c0_48 = arith.constant 0 : index
    %c0_49 = arith.constant 0 : index
    %64 = vector.load %arg10[%c0_48, %c0_49] : memref<1x128xf32, #tpu.memory_space<vmem>>, vector<1x128xf32>
    %65 = arith.addf %63, %64 : vector<1x128xf32>
    %cst_50 = arith.constant 0.000000e+00 : f32
    %66 = vector.broadcast %cst_50 : f32 to vector<1x128xf32>
    %67 = arith.maximumf %65, %66 : vector<1x128xf32>
    %c0_51 = arith.constant 0 : index
    %c0_52 = arith.constant 0 : index
    %68 = vector.load %arg11[%c0_51, %c0_52] : memref<128x128xf32, #tpu.memory_space<vmem>>, vector<128x128xf32>
    %cst_53 = arith.constant dense<0.000000e+00> : vector<1x128xf32>
    %69 = tpu.matmul %67, %68, %cst_53 {dimension_numbers = #tpu.dot_dimension_numbers<[1], [0], [0], [1], [0, 0, 1, 1], [], []>} : vector<1x128xf32>, vector<128x128xf32>, vector<1x128xf32> -> vector<1x128xf32>
    %c0_54 = arith.constant 0 : index
    %c0_55 = arith.constant 0 : index
    %c0_56 = arith.constant 0 : index
    %70 = vector.load %arg3[%c0_54, %c0_55, %c0_56] : memref<1x1x128xf32, #tpu.memory_space<vmem>>, vector<1x1x128xf32>
    %71 = vector.shape_cast %70 : vector<1x1x128xf32> to vector<1x128xf32>
    %c0_57 = arith.constant 0 : index
    %c0_58 = arith.constant 0 : index
    %72 = vector.load %arg12[%c0_57, %c0_58] : memref<128x128xf32, #tpu.memory_space<vmem>>, vector<128x128xf32>
    %cst_59 = arith.constant dense<0.000000e+00> : vector<1x128xf32>
    %73 = tpu.matmul %71, %72, %cst_59 {dimension_numbers = #tpu.dot_dimension_numbers<[1], [0], [0], [1], [0, 0, 1, 1], [], []>} : vector<1x128xf32>, vector<128x128xf32>, vector<1x128xf32> -> vector<1x128xf32>
    %74 = arith.addf %69, %73 : vector<1x128xf32>
    %c0_60 = arith.constant 0 : index
    %c0_61 = arith.constant 0 : index
    %75 = vector.load %arg13[%c0_60, %c0_61] : memref<1x128xf32, #tpu.memory_space<vmem>>, vector<1x128xf32>
    %76 = arith.addf %74, %75 : vector<1x128xf32>
    %cst_62 = arith.constant 0.000000e+00 : f32
    %77 = vector.broadcast %cst_62 : f32 to vector<1x128xf32>
    %78 = arith.maximumf %76, %77 : vector<1x128xf32>
    %c0_63 = arith.constant 0 : index
    %c0_64 = arith.constant 0 : index
    %79 = vector.load %arg14[%c0_63, %c0_64] : memref<128x128xf32, #tpu.memory_space<vmem>>, vector<128x128xf32>
    %cst_65 = arith.constant dense<0.000000e+00> : vector<1x128xf32>
    %80 = tpu.matmul %78, %79, %cst_65 {dimension_numbers = #tpu.dot_dimension_numbers<[1], [0], [0], [1], [0, 0, 1, 1], [], []>} : vector<1x128xf32>, vector<128x128xf32>, vector<1x128xf32> -> vector<1x128xf32>
    %c0_66 = arith.constant 0 : index
    %c0_67 = arith.constant 0 : index
    %81 = vector.load %arg15[%c0_66, %c0_67] : memref<1x128xf32, #tpu.memory_space<vmem>>, vector<1x128xf32>
    %82 = arith.addf %80, %81 : vector<1x128xf32>
    %c0_68 = arith.constant 0 : index
    %c0_69 = arith.constant 0 : index
    %c0_70 = arith.constant 0 : index
    %83 = vector.load %arg16[%c0_68, %c0_69, %c0_70] : memref<1x1x128xf32, #tpu.memory_space<vmem>>, vector<1x1x128xf32>
    %84 = vector.shape_cast %83 : vector<1x1x128xf32> to vector<1x128xf32>
    %85 = vector.shape_cast %82 : vector<1x128xf32> to vector<1x1x128xf32>
    tpu.vector_store %arg16[%c0_68, %c0_69, %c0_70], %85 {strides = array<i32>} : memref<1x1x128xf32, #tpu.memory_space<vmem>>, vector<1x1x128xf32>,
    return
  }
  func.func @transform_0(%arg0: i32) -> (i32, i32, i32) {
    %c0_i32 = arith.constant 0 : i32
    %c0_i32_0 = arith.constant 0 : i32
    %c0_i32_1 = arith.constant 0 : i32
    return %arg0, %c0_i32, %c0_i32_0 : i32, i32, i32
  }
  func.func @transform_1(%arg0: i32) -> (i32, i32, i32) {
    %c0_i32 = arith.constant 0 : i32
    %c0_i32_0 = arith.constant 0 : i32
    %c0_i32_1 = arith.constant 0 : i32
    return %arg0, %c0_i32, %c0_i32_0 : i32, i32, i32
  }
  func.func @transform_2(%arg0: i32) -> (i32, i32, i32) {
    %c0_i32 = arith.constant 0 : i32
    %c0_i32_0 = arith.constant 0 : i32
    %c0_i32_1 = arith.constant 0 : i32
    return %arg0, %c0_i32, %c0_i32_0 : i32, i32, i32
  }
  func.func @transform_3(%arg0: i32) -> (i32, i32, i32) {
    %c0_i32 = arith.constant 0 : i32
    %c0_i32_0 = arith.constant 0 : i32
    %c0_i32_1 = arith.constant 0 : i32
    %c0_i32_2 = arith.constant 0 : i32
    return %c0_i32, %c0_i32_0, %c0_i32_1 : i32, i32, i32
  }
  func.func @transform_4(%arg0: i32) -> (i32, i32) {
    %c0_i32 = arith.constant 0 : i32
    %c0_i32_0 = arith.constant 0 : i32
    %c0_i32_1 = arith.constant 0 : i32
    return %c0_i32, %c0_i32_0 : i32, i32
  }
  func.func @transform_5(%arg0: i32) -> (i32, i32, i32) {
    %c0_i32 = arith.constant 0 : i32
    %c0_i32_0 = arith.constant 0 : i32
    %c0_i32_1 = arith.constant 0 : i32
    %c0_i32_2 = arith.constant 0 : i32
    return %c0_i32, %c0_i32_0, %c0_i32_1 : i32, i32, i32
  }
  func.func @transform_6(%arg0: i32) -> (i32, i32) {
    %c0_i32 = arith.constant 0 : i32
    %c0_i32_0 = arith.constant 0 : i32
    %c0_i32_1 = arith.constant 0 : i32
    return %c0_i32, %c0_i32_0 : i32, i32
  }
  func.func @transform_7(%arg0: i32) -> (i32, i32, i32) {
    %c0_i32 = arith.constant 0 : i32
    %c0_i32_0 = arith.constant 0 : i32
    %c0_i32_1 = arith.constant 0 : i32
    %c0_i32_2 = arith.constant 0 : i32
    return %c0_i32, %c0_i32_0, %c0_i32_1 : i32, i32, i32
  }
  func.func @transform_8(%arg0: i32) -> (i32, i32) {
    %c0_i32 = arith.constant 0 : i32
    %c0_i32_0 = arith.constant 0 : i32
    %c0_i32_1 = arith.constant 0 : i32
    return %c0_i32, %c0_i32_0 : i32, i32
  }
  func.func @transform_9(%arg0: i32) -> (i32, i32) {
    %c0_i32 = arith.constant 0 : i32
    %c0_i32_0 = arith.constant 0 : i32
    %c0_i32_1 = arith.constant 0 : i32
    return %c0_i32, %c0_i32_0 : i32, i32
  }
  func.func @transform_10(%arg0: i32) -> (i32, i32) {
    %c0_i32 = arith.constant 0 : i32
    %c0_i32_0 = arith.constant 0 : i32
    %c0_i32_1 = arith.constant 0 : i32
    return %c0_i32, %c0_i32_0 : i32, i32
  }
  func.func @transform_11(%arg0: i32) -> (i32, i32) {
    %c0_i32 = arith.constant 0 : i32
    %c0_i32_0 = arith.constant 0 : i32
    %c0_i32_1 = arith.constant 0 : i32
    return %c0_i32, %c0_i32_0 : i32, i32
  }
  func.func @transform_12(%arg0: i32) -> (i32, i32) {
    %c0_i32 = arith.constant 0 : i32
    %c0_i32_0 = arith.constant 0 : i32
    %c0_i32_1 = arith.constant 0 : i32
    return %c0_i32, %c0_i32_0 : i32, i32
  }
  func.func @transform_13(%arg0: i32) -> (i32, i32) {
    %c0_i32 = arith.constant 0 : i32
    %c0_i32_0 = arith.constant 0 : i32
    %c0_i32_1 = arith.constant 0 : i32
    return %c0_i32, %c0_i32_0 : i32, i32
  }
  func.func @transform_14(%arg0: i32) -> (i32, i32) {
    %c0_i32 = arith.constant 0 : i32
    %c0_i32_0 = arith.constant 0 : i32
    %c0_i32_1 = arith.constant 0 : i32
    return %c0_i32, %c0_i32_0 : i32, i32
  }
  func.func @transform_15(%arg0: i32) -> (i32, i32, i32) {
    %c0_i32 = arith.constant 0 : i32
    %c0_i32_0 = arith.constant 0 : i32
    %c0_i32_1 = arith.constant 0 : i32
    return %arg0, %c0_i32, %c0_i32_0 : i32, i32, i32
  }
}

</mosaic_0001>

<bundles_post_ra>
// kernel: critic_forward.1
= control target key start
LH: loop header
LB: loop body
LE: loop exit
PB: predicated region body
PF: predicated region fallthrough
CT: control target
= control target key end

     0   :  { %s5417_s0 = inlined_call_operand.vmem [shape: f32[2,8,96], index: 0, kind: input, shape index: {}]   ;;  %s5418_s1 = inlined_call_operand.vmem [shape: f32[2,1,128], index: 1, kind: input, shape index: {}]   ;;  %s5419_s2 = inlined_call_operand.vmem [shape: f32[2,1,128], index: 2, kind: input, shape index: {}]   ;;  %s5420_s3 = inlined_call_operand.vmem [shape: f32[2,96,224], index: 3, kind: input, shape index: {}]   ;;  %s5421_s4 = inlined_call_operand.hbm [shape: f32[1,224], index: 4, kind: input, shape index: {}]   ;;  %s5422_s5 = inlined_call_operand.vmem [shape: f32[2,224,384], index: 5, kind: input, shape index: {}]   ;;  %s5423_s6 = inlined_call_operand.hbm [shape: f32[1,384], index: 6, kind: input, shape index: {}]   ;;  %s5424_s7 = inlined_call_operand.hbm [shape: f32[6,384,128], index: 7, kind: input, shape index: {}]   ;;  %s5425_s8 = inlined_call_operand.vmem [shape: f32[128,128], index: 8, kind: input, shape index: {}]   ;;  %s5426_s9 = inlined_call_operand.hbm [shape: f32[1,128], index: 9, kind: input, shape index: {}]   ;;  %s5427_s10 = inlined_call_operand.vmem [shape: f32[128,128], index: 10, kind: input, shape index: {}]   ;;  %s5428_s11 = inlined_call_operand.vmem [shape: f32[128,128], index: 11, kind: input, shape index: {}]   ;;  %s5429_s12 = inlined_call_operand.hbm [shape: f32[1,128], index: 12, kind: input, shape index: {}]   ;;  %s5430_s13 = inlined_call_operand.vmem [shape: f32[128,128], index: 13, kind: input, shape index: {}]   ;;  %s5431_s14 = inlined_call_operand.hbm [shape: f32[1,128], index: 14, kind: input, shape index: {}]   ;;  %s5432_s15 = inlined_call_operand.vmem [shape: f32[2,1,128], index: 15, kind: output, shape index: {}]  }
   0x1   :  { %5434 = sst [smem:[#allocation16_spill]] %s5421_s4 }
   0x2   :  { %20 = vsyncpa [#allocation3], 0 }
   0x3   :  { %21 = vsyncpa [#allocation5], 0 }
   0x4   :  { %22 = vsyncpa [#allocation8], 0 }
   0x5   :  { %23 = vsyncpa [#allocation11], 0  ;;  %s4149_s18 = smov 0  }
   0x6 LB: > { %s4059_s19 = smov [#allocation4]   ;;  %s4155_s21 = sadd.s32 4294967295, %s4057_s18   ;;  %s4057_s18 = sphi %s4149_s18, %s29_s18  }
   0x7   : > { %s420_s20 = sshll.u32 %s4059_s19, 4  ;;  %p2944_p0 = scmp.ge.s32.totalorder %s4057_s18, 1  ;;  %s421_s20 = int_to_ptr.vmem [resolvable:$true] %s420_s20 }
   0x8   : > { %p390_p1 = scmp.lt.s32.totalorder %s4057_s18, 3  ;;  %p5433_p2 = scmp.eq.s32.totalorder %s4155_s21, 0 }
   0x9   : > { %s4060_s23 = smov [#allocation7]   ;;  %s4061_s25 = smov [#allocation2]  }
   0xa   : > { %p4160_p3 = pnand %p2944_p0, %p390_p1  ;;  %s447_s24 = sshll.u32 %s4060_s23, 4  ;;  %s4166_s24 = int_to_ptr.vmem [resolvable:$true] %s447_s24 }
   0xb   : > { %s406_s26 = sshll.u32 %s4061_s25, 4  ;;  %s4062_s28 = smov [#allocation6]   ;;  %s4174_s26 = int_to_ptr.vmem [resolvable:$true] %s406_s26 }
   0xc   : > { %p3830_p4 = pneg %p4160_p3  ;;  %s430_s29 = sshll.u32 %s4062_s28, 4  ;;  %s4176_s29 = int_to_ptr.vmem [resolvable:$true] %s430_s29 }
   0xd   : > { %s3890_s16 = scalar_lea.vmem %s421_s20, 48  ;;  %s3897_s17 = scalar_lea.vmem %s421_s20, 64 }
   0xe   : > { %p4170_p5 = pnand %p5433_p2, %p3830_p4  ;;  %p3891_p7 = scmp.ne.s32.totalorder %s421_s20, %s3890_s16 }
   0xf   : > { %p3898_p10 = scmp.lt.s32.totalorder %s421_s20, %s421_s20  ;;  %p3899_p11 = scmp.lt.s32.totalorder %s3897_s17, %s3890_s16 }
  0x10   : > { %p4180_p6 = pneg %p4170_p5 }
  0x11   : > { %p3900_p12 = por %p3899_p11, %p3898_p10 }
  0x12   : > { %p3893_p8 = pnand %p3891_p7, %p4180_p6 }
  0x14   : > { %p3894_p9 = pneg %p3893_p8 }
  0x16   : > { %p3901_p13 = pnand %p3900_p12, %p3894_p9 }
  0x18   : > { %3904 = shalt.err (!%p3901_p13)
}
  0x19   : > { %3836 = dma.hbm_to_vmem [thread:$0]  (!%p4170_p5), %s5423_s6, 48, %s421_s20, [#allocation5]  }
  0x1a   : > { %s3916_s25 = scalar_lea.vmem %s4166_s24, 16  ;;  %s3923_s28 = scalar_lea.vmem %s4166_s24, 32 }
  0x1b   : > { %p3917_p0 = scmp.ne.s32.totalorder %s4166_s24, %s3916_s25  ;;  %p3924_p7 = scmp.lt.s32.totalorder %s4166_s24, %s4166_s24 }
  0x1c   : > { %p3925_p8 = scmp.lt.s32.totalorder %s3923_s28, %s3916_s25 }
  0x1d   : > { %p3919_p1 = pnand %p3917_p0, %p4180_p6 }
  0x1e   : > { %p3926_p9 = por %p3925_p8, %p3924_p7 }
  0x1f   : > { %p3920_p4 = pneg %p3919_p1 }
  0x21   : > { %p3927_p10 = pnand %p3926_p9, %p3920_p4 }
  0x23   : > { %3930 = shalt.err (!%p3927_p10)
}
  0x24   : > { %3842 = dma.hbm_to_vmem [thread:$0]  (!%p4170_p5), %s5426_s9, 16, %s4166_s24, [#allocation8]  }
  0x25   : > { %s3942_s20 = scalar_lea.vmem %s4174_s26, 32  ;;  %p3950_p0 = scmp.lt.s32.totalorder %s4174_s26, %s4174_s26 }
  0x26   : > { %p3943_p11 = scmp.ne.s32.totalorder %s4174_s26, %s3942_s20  ;;  %p3951_p1 = scmp.lt.s32.totalorder %s3942_s20, %s3942_s20 }
  0x28   : > { %p3945_p12 = pnand %p3943_p11, %p4180_p6  ;;  %p3952_p4 = por %p3951_p1, %p3950_p0 }
  0x2a   : > { %p3946_p13 = pneg %p3945_p12 }
  0x2c   : > { %p3953_p7 = pnand %p3952_p4, %p3946_p13 }
  0x2e   : > { %3956 = shalt.err (!%p3953_p7)
}
  0x2f   : > { %s5438_s4 = sld [smem:[#allocation16_spill]]  ;;  %s3968_s24 = scalar_lea.vmem %s4176_s29, 36864 }
  0x30   : > { %p3969_p8 = scmp.ne.s32.totalorder %s4176_s29, %s3968_s24  ;;  %p3976_p11 = scmp.lt.s32.totalorder %s4176_s29, %s4176_s29 }
  0x31   : > { %p3977_p12 = scmp.lt.s32.totalorder %s3968_s24, %s3968_s24 }
  0x32   : > { %p3971_p9 = pnand %p3969_p8, %p4180_p6 }
  0x33   : > { %p3978_p13 = por %p3977_p12, %p3976_p11 }
  0x34   : > { %p3972_p10 = pneg %p3971_p9 }
  0x35   : > { %3833 = dma.hbm_to_vmem [thread:$0]  (!%p4170_p5), %s5438_s4, 32, %s4174_s26, [#allocation3]  }
  0x36   : > { %p3979_p0 = pnand %p3978_p13, %p3972_p10 }
  0x38   : > { %3982 = shalt.err (!%p3979_p0)
}
  0x39   : > { %s4063_s25 = smov 128   ;;  %s4064_s28 = smov 8  }
  0x3a   : > { %3839 = dma.hbm_to_vmem [thread:$0]  (!%p4170_p5), %s5424_s7, 36864, %s4176_s29, [#allocation5], %s4063_s25, %s4063_s25, %s4064_s28  }
  0x3b   : > { %s4065_s26 = smov [#allocation9]   ;;  %s4066_s19 = smov [#allocation10]  }
  0x3c   : > { %s464_s20 = sshll.u32 %s4065_s26, 4  ;;  %s478_s23 = sshll.u32 %s4066_s19, 4  ;;  %s465_s20 = int_to_ptr.vmem [resolvable:$true] %s464_s20  ;;  %s479_s23 = int_to_ptr.vmem [resolvable:$true] %s478_s23 }
  0x3d   : > { %s3994_s4 = scalar_lea.vmem %s465_s20, 16  ;;  %s4001_s24 = scalar_lea.vmem %s465_s20, 32 }
  0x3e   : > { %p3995_p1 = scmp.ne.s32.totalorder %s465_s20, %s3994_s4  ;;  %p4002_p8 = scmp.lt.s32.totalorder %s465_s20, %s465_s20 }
  0x3f   : > { %p4003_p9 = scmp.lt.s32.totalorder %s4001_s24, %s3994_s4 }
  0x40   : > { %p3997_p4 = pnand %p3995_p1, %p4180_p6 }
  0x41   : > { %p4004_p10 = por %p4003_p9, %p4002_p8 }
  0x42   : > { %p3998_p7 = pneg %p3997_p4 }
  0x44   : > { %p4005_p11 = pnand %p4004_p10, %p3998_p7 }
  0x46   : > { %4008 = shalt.err (!%p4005_p11)
}
  0x47   : > { %3845 = dma.hbm_to_vmem [thread:$0]  (!%p4170_p5), %s5429_s12, 16, %s465_s20, [#allocation8]  }
  0x48   : > { %s4020_s25 = scalar_lea.vmem %s479_s23, 16  ;;  %s4027_s28 = scalar_lea.vmem %s479_s23, 32 }
  0x49   : > { %p4021_p12 = scmp.ne.s32.totalorder %s479_s23, %s4020_s25  ;;  %p4028_p1 = scmp.lt.s32.totalorder %s479_s23, %s479_s23 }
  0x4a   : > { %p4029_p4 = scmp.lt.s32.totalorder %s4027_s28, %s4020_s25 }
  0x4b   : > { %p4023_p13 = pnand %p4021_p12, %p4180_p6 }
  0x4c   : > { %p4030_p2 = por %p4029_p4, %p4028_p1 }
  0x4d   : > { %p4024_p0 = pneg %p4023_p13 }
  0x4f   : > { %p4031_p8 = pnand %p4030_p2, %p4024_p0 }
  0x51   : > { %4034 = shalt.err (!%p4031_p8)
}
  0x52   : > { %3848 = dma.hbm_to_vmem [thread:$0]  (!%p4170_p5), %s5431_s14, 16, %s479_s23, [#allocation11]  }
  0x53   : > { %510 = sbr.rel (%p4160_p3) target bundleno = 1384 (0x568), region = 80  ;;  %p5439_p7 = scmp.eq.s32.totalorder (!%p4160_p3), %s4155_s21, 0 }
  0x58   : > { %4040 = dma.done.wait (%p5439_p7), [#allocation3], 32   ;;  %p5440_p6 = pmov %p5439_p7 }
  0x5a   : > { %4042 = vsyncadd (%p5440_p6), [#allocation3], 4294967264  ;;  %p5441_p9 = pmov %p5440_p6 }
  0x5b   : > { %p5442_p2 = pmov %p5440_p6 }
  0x5c   : > { %4044 = dma.done.wait (%p5441_p9), [#allocation5], 36912  }
  0x5d   : > { %4046 = vsyncadd (%p5442_p2), [#allocation5], 4294930384  ;;  %p5443_p10 = pmov %p5442_p2 }
  0x5e   : > { %p5444_p5 = pmov %p5442_p2 }
  0x5f   : > { %4048 = dma.done.wait (%p5443_p10), [#allocation8], 32  }
  0x60   : > { %4050 = vsyncadd (%p5444_p5), [#allocation8], 4294967264  ;;  %p5445_p3 = pmov %p5442_p2 }
  0x61   : > { %p5446_p11 = pmov %p5442_p2 }
  0x62   : > { %4052 = dma.done.wait (%p5445_p3), [#allocation11], 16  }
  0x63   : > { %4054 = vsyncadd (%p5446_p11), [#allocation11], 4294967280  ;;  %v4067_v0 = vmov 0.0   ;;  %v2983_v1 = vld [vmem:[%s5420_s3 + $0x178] sm:$0xff]  ;;  %v2982_v3 = vld [vmem:[%s5420_s3 + $0x170] sm:$0xff]  ;;  %p581_p12 = scmp.lt.s32.totalorder %s4155_s21, 1 }
  0x64   : > { %713 = vmatprep.mubr.f32.mxu0 %v4067_v0  ;;  %786 = vmatprep.mubr.f32.mxu1 %v4067_v0  ;;  %v618_v2 = vld [vmem:[%s5420_s3 + $0xb8] sm:$0xff]  ;;  %v617_v4 = vld [vmem:[%s5420_s3 + $0xb0] sm:$0xff]  ;;  %v2981_v5 = vld [vmem:[%s5420_s3 + $0x168] sm:$0xff]  ;;  %vm646_vm0 = vcmask 785408   ;;  %vm4068_vm1 = vmmov 0  }
  0x65   : > { %657 = vmatprep.subr.mxu0 %v2983_v1  ;;  %730 = vmatprep.subr.mxu1 %v618_v2  ;;  %v616_v6 = vld [vmem:[%s5420_s3 + $0xa8] sm:$0xff]  ;;  %v2980_v7 = vld [vmem:[%s5420_s3 + $0x160] sm:$0xff]  ;;  %v2979_v9 = vld [vmem:[%s5420_s3 + $0x158] sm:$0xff]  ;;  %s5448_s21 = smov (!%p581_p12, %s4155_s21), 1 }
  0x66   : > { %658 = vmatpush1.msra.mxu0 %v2982_v3  ;;  %731 = vmatpush1.msra.mxu1 %v617_v4  ;;  %v615_v8 = vld [vmem:[%s5420_s3 + $0xa0] sm:$0xff]  ;;  %v614_v10 = vld [vmem:[%s5420_s3 + $0x98] sm:$0xff]  ;;  %v2978_v11 = vld [vmem:[%s5420_s3 + $0x150] sm:$0xff]  ;;  %s2959_s20 = sshll.u32 %s5448_s21, 3  ;;  %s587_s16 = scalar_lea.vmem %s5418_s1, %s5448_s21 }
  0x67   : > { %659 = vmatprep.subr.mxu0 %v2981_v5  ;;  %732 = vmatprep.subr.mxu1 %v616_v6  ;;  %v613_v12 = vld [vmem:[%s5420_s3 + $0x90] sm:$0xff]  ;;  %v2977_v13 = vld [vmem:[%s5420_s3 + $0x148] sm:$0xff]  ;;  %v2976_v15 = vld [vmem:[%s5420_s3 + $0x140] sm:$0xff]  ;;  %s584_s23 = scalar_lea.vmem %s5417_s0, %s2959_s20  ;;  %s590_s26 = scalar_lea.vmem %s5419_s2, %s5448_s21 }
  0x68   : > { %660 = vmatpush1.msra.mxu0 %v2980_v7  ;;  %733 = vmatpush1.msra.mxu1 %v615_v8  ;;  %v612_v14 = vld [vmem:[%s5420_s3 + $0x88] sm:$0xff]  ;;  %v611_v16 = vld [vmem:[%s5420_s3 + $0x80] sm:$0xff]  ;;  %v2975_v17 = vld [vmem:[%s5420_s3 + $0x138] sm:$0xff] }
  0x69   : > { %661 = vmatprep.subr.mxu0 %v2979_v9  ;;  %734 = vmatprep.subr.mxu1 %v614_v10  ;;  %v610_v18 = vld [vmem:[%s5420_s3 + $0x78] sm:$0xff]  ;;  %v2974_v19 = vld [vmem:[%s5420_s3 + $0x130] sm:$0xff]  ;;  %v2973_v21 = vld [vmem:[%s5420_s3 + $0x128] sm:$0xff] }
  0x6a   : > { %662 = vmatpush1.msra.mxu0 %v2978_v11  ;;  %735 = vmatpush1.msra.mxu1 %v613_v12  ;;  %v609_v20 = vld [vmem:[%s5420_s3 + $0x70] sm:$0xff]  ;;  %v608_v22 = vld [vmem:[%s5420_s3 + $0x68] sm:$0xff]  ;;  %v2972_v23 = vld [vmem:[%s5420_s3 + $0x120] sm:$0xff] }
  0x6b   : > { %663 = vmatprep.subr.mxu0 %v2977_v13  ;;  %736 = vmatprep.subr.mxu1 %v612_v14  ;;  %v607_v24 = vld [vmem:[%s5420_s3 + $0x60] sm:$0xff]  ;;  %v2971_v25 = vld [vmem:[%s5420_s3 + $0x118] sm:$0xff]  ;;  %v2970_v27 = vld [vmem:[%s5420_s3 + $0x110] sm:$0xff] }
  0x6c   : > { %664 = vmatpush1.msra.mxu0 %v2976_v15  ;;  %737 = vmatpush1.msra.mxu1 %v611_v16  ;;  %v606_v26 = vld [vmem:[%s5420_s3 + $0x58] sm:$0xff]  ;;  %v605_v28 = vld [vmem:[%s5420_s3 + $0x50] sm:$0xff]  ;;  %v2969_v29 = vld [vmem:[%s5420_s3 + $0x108] sm:$0xff] }
  0x6d   : > { %665 = vmatprep.subr.mxu0 %v2975_v17  ;;  %738 = vmatprep.subr.mxu1 %v610_v18  ;;  %v604_v30 = vld [vmem:[%s5420_s3 + $0x48] sm:$0xff]  ;;  %v2968_v31 = vld [vmem:[%s5420_s3 + $0x100] sm:$0xff]  ;;  %v2967_v33 = vld [vmem:[%s5420_s3 + $0xf8] sm:$0xff] }
  0x6e   : > { %666 = vmatpush1.msra.mxu0 %v2974_v19  ;;  %739 = vmatpush1.msra.mxu1 %v609_v20  ;;  %v603_v32 = vld [vmem:[%s5420_s3 + $0x40] sm:$0xff]  ;;  %v602_v34 = vld [vmem:[%s5420_s3 + $0x38] sm:$0xff]  ;;  %v2966_v35 = vld [vmem:[%s5420_s3 + $0xf0] sm:$0xff] }
  0x6f   : > { %667 = vmatprep.subr.mxu0 %v2973_v21  ;;  %740 = vmatprep.subr.mxu1 %v608_v22  ;;  %v601_v36 = vld [vmem:[%s5420_s3 + $0x30] sm:$0xff]  ;;  %v2965_v37 = vld [vmem:[%s5420_s3 + $0xe8] sm:$0xff]  ;;  %v2964_v39 = vld [vmem:[%s5420_s3 + $0xe0] sm:$0xff] }
  0x70   : > { %668 = vmatpush1.msra.mxu0 %v2972_v23  ;;  %741 = vmatpush1.msra.mxu1 %v607_v24  ;;  %v600_v38 = vld [vmem:[%s5420_s3 + $0x28] sm:$0xff]  ;;  %v599_v40 = vld [vmem:[%s5420_s3 + $0x20] sm:$0xff]  ;;  %v2963_v41 = vld [vmem:[%s5420_s3 + $0xd8] sm:$0xff] }
  0x71   : > { %669 = vmatprep.subr.mxu0 %v2971_v25  ;;  %742 = vmatprep.subr.mxu1 %v606_v26  ;;  %v598_v42 = vld [vmem:[%s5420_s3 + $0x18] sm:$0xff]  ;;  %v594_v43 = vld [vmem:[%s584_s23] sm:$0xff]  ;;  %v2962_v44 = vld [vmem:[%s5420_s3 + $0xd0] sm:$0xff]  ;;  %s593_s23 = scalar_lea.vmem %s5432_s15, %s5448_s21 }
  0x72   : > { %670 = vmatpush1.msra.mxu0 %v2970_v27  ;;  %743 = vmatpush1.msra.mxu1 %v605_v28  ;;  %v597_v45 = vld [vmem:[%s5420_s3 + $0x10] sm:$0xff]  ;;  %v2961_v46 = vld [vmem:[%s5420_s3 + $0xc8] sm:$0xff]  ;;  %v2960_v48 = vld [vmem:[%s5420_s3 + $0xc0] sm:$0xff]  ;;  %v645_v50 = vrot.slane %v594_v43, 1 }
  0x73   : > { %671 = vmatprep.subr.mxu0 %v2969_v29  ;;  %744 = vmatprep.subr.mxu1 %v604_v30  ;;  %v596_v47 = vld [vmem:[%s5420_s3 + $0x8] sm:$0xff]  ;;  %v595_v49 = vld [vmem:[%s5420_s3] sm:$0xff]  ;;  %v3032_v51 = vld [vmem:[%s5422_s5 + $0x410] sm:$0xff] }
  0x74   : > { %672 = vmatpush1.msra.mxu0 %v2968_v31  ;;  %745 = vmatpush1.msra.mxu1 %v603_v32  ;;  %v3031_v52 = vld [vmem:[%s5422_s5 + $0x408] sm:$0xff]  ;;  %v3033_v53 = vld [vmem:[%s5422_s5 + $0x418] sm:$0xff]  ;;  %v3028_v55 = vld [vmem:[%s5422_s5 + $0x3f0] sm:$0xff] }
  0x75   : > { %673 = vmatprep.subr.mxu0 %v2967_v33  ;;  %746 = vmatprep.subr.mxu1 %v602_v34  ;;  %v3029_v54 = vld [vmem:[%s5422_s5 + $0x3f8] sm:$0xff]  ;;  %v3030_v56 = vld [vmem:[%s5422_s5 + $0x400] sm:$0xff]  ;;  %v3027_v59 = vld [vmem:[%s5422_s5 + $0x3e8] sm:$0xff] }
  0x76   : > { %674 = vmatpush1.msra.mxu0 %v2966_v35  ;;  %747 = vmatpush1.msra.mxu1 %v601_v36  ;;  %v3026_v57 = vld [vmem:[%s5422_s5 + $0x3e0] sm:$0xff]  ;;  %v3025_v58 = vld [vmem:[%s5422_s5 + $0x3d8] sm:$0xff]  ;;  %v3023_v60 = vld [vmem:[%s5422_s5 + $0x3c8] sm:$0xff] }
  0x77   : > { %675 = vmatprep.subr.mxu0 %v2965_v37  ;;  %748 = vmatprep.subr.mxu1 %v600_v38  ;;  %v3022_v61 = vld [vmem:[%s5422_s5 + $0x3c0] sm:$0xff]  ;;  %v3024_v62 = vld [vmem:[%s5422_s5 + $0x3d0] sm:$0xff]  ;;  %v3019_v1 = vld [vmem:[%s5422_s5 + $0x3a8] sm:$0xff] }
  0x78   : > { %676 = vmatpush1.msra.mxu0 %v2964_v39  ;;  %749 = vmatpush1.msra.mxu1 %v599_v40  ;;  %v3020_v63 = vld [vmem:[%s5422_s5 + $0x3b0] sm:$0xff]  ;;  %v3021_v2 = vld [vmem:[%s5422_s5 + $0x3b8] sm:$0xff]  ;;  %v3018_v5 = vld [vmem:[%s5422_s5 + $0x3a0] sm:$0xff] }
  0x79   : > { %677 = vmatprep.subr.mxu0 %v2963_v41  ;;  %750 = vmatprep.subr.mxu1 %v598_v42  ;;  %v3017_v3 = vld [vmem:[%s5422_s5 + $0x398] sm:$0xff]  ;;  %v3016_v4 = vld [vmem:[%s5422_s5 + $0x390] sm:$0xff]  ;;  %v3014_v6 = vld [vmem:[%s5422_s5 + $0x380] sm:$0xff] }
  0x7a   : > { %678 = vmatpush1.msra.mxu0 %v2962_v44  ;;  %751 = vmatpush1.msra.mxu1 %v597_v45  ;;  %v3013_v7 = vld [vmem:[%s5422_s5 + $0x378] sm:$0xff]  ;;  %v3015_v8 = vld [vmem:[%s5422_s5 + $0x388] sm:$0xff]  ;;  %v3010_v10 = vld [vmem:[%s5422_s5 + $0x360] sm:$0xff] }
  0x7b   : > { %679 = vmatprep.subr.mxu0 %v2961_v46  ;;  %752 = vmatprep.subr.mxu1 %v596_v47  ;;  %v3011_v9 = vld [vmem:[%s5422_s5 + $0x368] sm:$0xff]  ;;  %v3012_v11 = vld [vmem:[%s5422_s5 + $0x370] sm:$0xff]  ;;  %v3009_v14 = vld [vmem:[%s5422_s5 + $0x358] sm:$0xff] }
  0x7c   : > { %680 = vmatpush1.msra.mxu0 %v2960_v48  ;;  %753 = vmatpush1.msra.mxu1 %v595_v49  ;;  %v3008_v12 = vld [vmem:[%s5422_s5 + $0x350] sm:$0xff]  ;;  %v3007_v13 = vld [vmem:[%s5422_s5 + $0x348] sm:$0xff]  ;;  %v3005_v15 = vld [vmem:[%s5422_s5 + $0x338] sm:$0xff] }
  0x7d   : > { %2984 = vmatmul.mubr.msk.f32.vlgmr.msra.gmra.mxu0 %vm646_vm0, %v645_v50  ;;  %2985 = vmatmul.mubr.msk.f32.vlgmr.msra.gmra.mxu1 %vm646_vm0, %v594_v43  ;;  %v3004_v16 = vld [vmem:[%s5422_s5 + $0x330] sm:$0xff]  ;;  %v3006_v17 = vld [vmem:[%s5422_s5 + $0x340] sm:$0xff]  ;;  %v3001_v19 = vld [vmem:[%s5422_s5 + $0x318] sm:$0xff] }
  0x7e   : > { %985 = vmatprep.subr.mxu0 %v3032_v51  ;;  %1056 = vmatprep.subr.mxu1 %v4067_v0  ;;  %v3002_v18 = vld [vmem:[%s5422_s5 + $0x320] sm:$0xff]  ;;  %v3003_v20 = vld [vmem:[%s5422_s5 + $0x328] sm:$0xff]  ;;  %v3000_v23 = vld [vmem:[%s5422_s5 + $0x310] sm:$0xff] }
  0x7f   : > { %986 = vmatpush1.msra.mxu0 %v3031_v52  ;;  %1057 = vmatpush1.msra.mxu1 %v3033_v53  ;;  %v2999_v21 = vld [vmem:[%s5422_s5 + $0x308] sm:$0xff]  ;;  %v2998_v22 = vld [vmem:[%s5422_s5 + $0x300] sm:$0xff]  ;;  %v2996_v24 = vld [vmem:[%s5422_s5 + $0x2f0] sm:$0xff] }
  0x80   : > { %987 = vmatprep.subr.mxu0 %v3029_v54  ;;  %1058 = vmatprep.subr.mxu1 %v4067_v0  ;;  %v2995_v25 = vld [vmem:[%s5422_s5 + $0x2e8] sm:$0xff]  ;;  %v2997_v26 = vld [vmem:[%s5422_s5 + $0x2f8] sm:$0xff]  ;;  %v2992_v28 = vld [vmem:[%s5422_s5 + $0x2d0] sm:$0xff] }
  0x81   : > { %988 = vmatpush1.msra.mxu0 %v3028_v55  ;;  %1059 = vmatpush1.msra.mxu1 %v3030_v56  ;;  %v2993_v27 = vld [vmem:[%s5422_s5 + $0x2d8] sm:$0xff]  ;;  %v2994_v29 = vld [vmem:[%s5422_s5 + $0x2e0] sm:$0xff]  ;;  %v2991_v32 = vld [vmem:[%s5422_s5 + $0x2c8] sm:$0xff] }
  0x82   : > { %989 = vmatprep.subr.mxu0 %v3026_v57  ;;  %1060 = vmatprep.subr.mxu1 %v4067_v0  ;;  %v2990_v30 = vld [vmem:[%s5422_s5 + $0x2c0] sm:$0xff]  ;;  %v2989_v31 = vld [vmem:[%s5422_s5 + $0x2b8] sm:$0xff]  ;;  %v2987_v33 = vld [vmem:[%s5422_s5 + $0x2a8] sm:$0xff] }
  0x83   : > { %990 = vmatpush1.msra.mxu0 %v3025_v58  ;;  %1061 = vmatpush1.msra.mxu1 %v3027_v59  ;;  %v2986_v34 = vld [vmem:[%s5422_s5 + $0x2a0] sm:$0xff]  ;;  %v2988_v35 = vld [vmem:[%s5422_s5 + $0x2b0] sm:$0xff]  ;;  %v3067_v37 = vld [vmem:[%s5422_s5 + $0x528] sm:$0xff] }
  0x84   : > { %991 = vmatprep.subr.mxu0 %v3023_v60  ;;  %1062 = vmatprep.subr.mxu1 %v4067_v0  ;;  %v3068_v36 = vld [vmem:[%s5422_s5 + $0x530] sm:$0xff]  ;;  %v3069_v38 = vld [vmem:[%s5422_s5 + $0x538] sm:$0xff]  ;;  %v3066_v41 = vld [vmem:[%s5422_s5 + $0x520] sm:$0xff] }
  0x85   : > { %992 = vmatpush1.msra.mxu0 %v3022_v61  ;;  %1063 = vmatpush1.msra.mxu1 %v3024_v62  ;;  %v3065_v39 = vld [vmem:[%s5422_s5 + $0x518] sm:$0xff]  ;;  %v3064_v40 = vld [vmem:[%s5422_s5 + $0x510] sm:$0xff]  ;;  %v3062_v42 = vld [vmem:[%s5422_s5 + $0x500] sm:$0xff] }
  0x86   : > { %993 = vmatprep.subr.mxu0 %v3020_v63  ;;  %1064 = vmatprep.subr.mxu1 %v4067_v0  ;;  %v3061_v43 = vld [vmem:[%s5422_s5 + $0x4f8] sm:$0xff]  ;;  %v3063_v44 = vld [vmem:[%s5422_s5 + $0x508] sm:$0xff]  ;;  %v3058_v46 = vld [vmem:[%s5422_s5 + $0x4e0] sm:$0xff] }
  0x87   : > { %994 = vmatpush1.msra.mxu0 %v3019_v1  ;;  %1065 = vmatpush1.msra.mxu1 %v3021_v2  ;;  %v3059_v45 = vld [vmem:[%s5422_s5 + $0x4e8] sm:$0xff]  ;;  %v3060_v47 = vld [vmem:[%s5422_s5 + $0x4f0] sm:$0xff]  ;;  %v3057_v50 = vld [vmem:[%s5422_s5 + $0x4d8] sm:$0xff] }
  0x88   : > { %995 = vmatprep.subr.mxu0 %v3017_v3  ;;  %1066 = vmatprep.subr.mxu1 %v4067_v0  ;;  %v3056_v48 = vld [vmem:[%s5422_s5 + $0x4d0] sm:$0xff]  ;;  %v3055_v49 = vld [vmem:[%s5422_s5 + $0x4c8] sm:$0xff]  ;;  %v3053_v51 = vld [vmem:[%s5422_s5 + $0x4b8] sm:$0xff] }
  0x89   : > { %996 = vmatpush1.msra.mxu0 %v3016_v4  ;;  %1067 = vmatpush1.msra.mxu1 %v3018_v5  ;;  %v3052_v52 = vld [vmem:[%s5422_s5 + $0x4b0] sm:$0xff]  ;;  %v3054_v53 = vld [vmem:[%s5422_s5 + $0x4c0] sm:$0xff]  ;;  %v3049_v55 = vld [vmem:[%s5422_s5 + $0x498] sm:$0xff] }
  0x8a   : > { %997 = vmatprep.subr.mxu0 %v3014_v6  ;;  %1068 = vmatprep.subr.mxu1 %v4067_v0  ;;  %v3050_v54 = vld [vmem:[%s5422_s5 + $0x4a0] sm:$0xff]  ;;  %v3051_v56 = vld [vmem:[%s5422_s5 + $0x4a8] sm:$0xff]  ;;  %v3048_v59 = vld [vmem:[%s5422_s5 + $0x490] sm:$0xff] }
  0x8b   : > { %998 = vmatpush1.msra.mxu0 %v3013_v7  ;;  %1069 = vmatpush1.msra.mxu1 %v3015_v8  ;;  %v3047_v57 = vld [vmem:[%s5422_s5 + $0x488] sm:$0xff]  ;;  %v3046_v58 = vld [vmem:[%s5422_s5 + $0x480] sm:$0xff]  ;;  %v3044_v60 = vld [vmem:[%s5422_s5 + $0x470] sm:$0xff] }
  0x8c   : > { %999 = vmatprep.subr.mxu0 %v3011_v9  ;;  %1070 = vmatprep.subr.mxu1 %v4067_v0  ;;  %v3043_v61 = vld [vmem:[%s5422_s5 + $0x468] sm:$0xff]  ;;  %v3045_v62 = vld [vmem:[%s5422_s5 + $0x478] sm:$0xff]  ;;  %v3040_v1 = vld [vmem:[%s5422_s5 + $0x450] sm:$0xff] }
  0x8d   : > { %1000 = vmatpush1.msra.mxu0 %v3010_v10  ;;  %1071 = vmatpush1.msra.mxu1 %v3012_v11  ;;  %v3041_v63 = vld [vmem:[%s5422_s5 + $0x458] sm:$0xff]  ;;  %v3042_v2 = vld [vmem:[%s5422_s5 + $0x460] sm:$0xff]  ;;  %v3039_v5 = vld [vmem:[%s5422_s5 + $0x448] sm:$0xff]  ;;  %v795_v10 = vlaneseq }
  0x8e   : > { %1001 = vmatprep.subr.mxu0 %v3008_v12  ;;  %1072 = vmatprep.subr.mxu1 %v4067_v0  ;;  %v3038_v3 = vld [vmem:[%s5422_s5 + $0x440] sm:$0xff]  ;;  %v3037_v4 = vld [vmem:[%s5422_s5 + $0x438] sm:$0xff]  ;;  %v3035_v6 = vld [vmem:[%s5422_s5 + $0x428] sm:$0xff] }
  0x8f   : > { %1002 = vmatpush1.msra.mxu0 %v3007_v13  ;;  %1073 = vmatpush1.msra.mxu1 %v3009_v14  ;;  %v3034_v7 = vld [vmem:[%s5422_s5 + $0x420] sm:$0xff]  ;;  %v3036_v8 = vld [vmem:[%s5422_s5 + $0x430] sm:$0xff]  ;;  %v4702_v11 = vshrl.u32 %v795_v10, 7  ;;  %v810_v10 = vld [vmem:[%s5422_s5 + $0x8] sm:$0xff] }
  0x90   : > { %1003 = vmatprep.subr.mxu0 %v3005_v15  ;;  %1074 = vmatprep.subr.mxu1 %v4067_v0  ;;  %v855_v9 = vld [vmem:[%s5422_s5 + $0x170] sm:$0xff]  ;;  %v793_v13 = vld [vmem:[#allocation2] sm:$0x3] }
  0x91   : > { %1004 = vmatpush1.msra.mxu0 %v3004_v16  ;;  %1075 = vmatpush1.msra.mxu1 %v3006_v17  ;;  %v797_v12 = vsub.s32 0, %v4702_v11  ;;  %v801_v14 = vsub.s32 1, %v4702_v11 }
  0x92   : > { %1005 = vmatprep.subr.mxu0 %v3002_v18  ;;  %1076 = vmatprep.subr.mxu1 %v4067_v0 }
  0x93   : > { %1006 = vmatpush1.msra.mxu0 %v3001_v19  ;;  %1077 = vmatpush1.msra.mxu1 %v3003_v20  ;;  %v798_v15 = vrot.slane %v793_v13, %v797_v12  ;;  %v802_v19 = vrot.slane %v793_v13, %v801_v14  ;;  %v809_v13 = vld [vmem:[%s5422_s5] sm:$0xff] }
  0x94   : > { %1007 = vmatprep.subr.mxu0 %v2999_v21  ;;  %1078 = vmatprep.subr.mxu1 %v4067_v0 }
  0x95   : > { %1008 = vmatpush1.msra.mxu0 %v2998_v22  ;;  %1079 = vmatpush1.msra.mxu1 %v3000_v23 }
  0x96   : > { %1009 = vmatprep.subr.mxu0 %v2996_v24  ;;  %1080 = vmatprep.subr.mxu1 %v4067_v0 }
  0x97   : > { %1010 = vmatpush1.msra.mxu0 %v2995_v25  ;;  %1081 = vmatpush1.msra.mxu1 %v2997_v26 }
  0x98   : > { %1011 = vmatprep.subr.mxu0 %v2993_v27  ;;  %1082 = vmatprep.subr.mxu1 %v4067_v0 }
  0x99   : > { %1012 = vmatpush1.msra.mxu0 %v2992_v28  ;;  %1083 = vmatpush1.msra.mxu1 %v2994_v29  ;;  %v854_v29 = vld [vmem:[%s5422_s5 + $0x168] sm:$0xff] }
  0x9a   : > { %1013 = vmatprep.subr.mxu0 %v2990_v30  ;;  %1084 = vmatprep.subr.mxu1 %v4067_v0  ;;  %v856_v30 = vld [vmem:[%s5422_s5 + $0x178] sm:$0xff] }
  0x9b   : > { %1014 = vmatpush1.msra.mxu0 %v2989_v31  ;;  %1085 = vmatpush1.msra.mxu1 %v2991_v32  ;;  %v852_v31 = vld [vmem:[%s5422_s5 + $0x158] sm:$0xff]  ;;  %v851_v32 = vld [vmem:[%s5422_s5 + $0x150] sm:$0xff] }
  0x9c   : > { %1015 = vmatprep.subr.mxu0 %v2987_v33  ;;  %1086 = vmatprep.subr.mxu1 %v4067_v0  ;;  %v853_v33 = vld [vmem:[%s5422_s5 + $0x160] sm:$0xff] }
  0x9d   : > { %1016 = vmatpush1.msra.mxu0 %v2986_v34  ;;  %1087 = vmatpush1.msra.mxu1 %v2988_v35  ;;  %v849_v34 = vld [vmem:[%s5422_s5 + $0x140] sm:$0xff]  ;;  %v848_v35 = vld [vmem:[%s5422_s5 + $0x138] sm:$0xff] }
  0x9e   : > { %1025 = vmatprep.subr.mxu0 %v3068_v36  ;;  %1096 = vmatprep.subr.mxu1 %v4067_v0  ;;  %v850_v36 = vld [vmem:[%s5422_s5 + $0x148] sm:$0xff] }
  0x9f   : > { %1026 = vmatpush2.msra.mxu0 %v3067_v37  ;;  %1097 = vmatpush2.msra.mxu1 %v3069_v38  ;;  %v846_v37 = vld [vmem:[%s5422_s5 + $0x128] sm:$0xff]  ;;  %v845_v38 = vld [vmem:[%s5422_s5 + $0x120] sm:$0xff] }
  0xa0   : > { %1027 = vmatprep.subr.mxu0 %v3065_v39  ;;  %1098 = vmatprep.subr.mxu1 %v4067_v0  ;;  %v847_v39 = vld [vmem:[%s5422_s5 + $0x130] sm:$0xff] }
  0xa1   : > { %1028 = vmatpush2.msra.mxu0 %v3064_v40  ;;  %1099 = vmatpush2.msra.mxu1 %v3066_v41  ;;  %v843_v40 = vld [vmem:[%s5422_s5 + $0x110] sm:$0xff]  ;;  %v842_v41 = vld [vmem:[%s5422_s5 + $0x108] sm:$0xff] }
  0xa2   : > { %1029 = vmatprep.subr.mxu0 %v3062_v42  ;;  %1100 = vmatprep.subr.mxu1 %v4067_v0  ;;  %v844_v42 = vld [vmem:[%s5422_s5 + $0x118] sm:$0xff] }
  0xa3   : > { %1030 = vmatpush2.msra.mxu0 %v3061_v43  ;;  %1101 = vmatpush2.msra.mxu1 %v3063_v44  ;;  %v840_v43 = vld [vmem:[%s5422_s5 + $0xf8] sm:$0xff]  ;;  %v839_v44 = vld [vmem:[%s5422_s5 + $0xf0] sm:$0xff] }
  0xa4   : > { %1031 = vmatprep.subr.mxu0 %v3059_v45  ;;  %1102 = vmatprep.subr.mxu1 %v4067_v0  ;;  %v841_v45 = vld [vmem:[%s5422_s5 + $0x100] sm:$0xff] }
  0xa5   : > { %1032 = vmatpush2.msra.mxu0 %v3058_v46  ;;  %1103 = vmatpush2.msra.mxu1 %v3060_v47  ;;  %v837_v46 = vld [vmem:[%s5422_s5 + $0xe0] sm:$0xff]  ;;  %v836_v47 = vld [vmem:[%s5422_s5 + $0xd8] sm:$0xff] }
  0xa6   : > { %1033 = vmatprep.subr.mxu0 %v3056_v48  ;;  %1104 = vmatprep.subr.mxu1 %v4067_v0  ;;  %v838_v48 = vld [vmem:[%s5422_s5 + $0xe8] sm:$0xff] }
  0xa7   : > { %1034 = vmatpush2.msra.mxu0 %v3055_v49  ;;  %1105 = vmatpush2.msra.mxu1 %v3057_v50  ;;  %v834_v49 = vld [vmem:[%s5422_s5 + $0xc8] sm:$0xff]  ;;  %v833_v50 = vld [vmem:[%s5422_s5 + $0xc0] sm:$0xff] }
  0xa8   : > { %1035 = vmatprep.subr.mxu0 %v3053_v51  ;;  %1106 = vmatprep.subr.mxu1 %v4067_v0  ;;  %v835_v51 = vld [vmem:[%s5422_s5 + $0xd0] sm:$0xff] }
  0xa9   : > { %1036 = vmatpush2.msra.mxu0 %v3052_v52  ;;  %1107 = vmatpush2.msra.mxu1 %v3054_v53  ;;  %v831_v52 = vld [vmem:[%s5422_s5 + $0xb0] sm:$0xff]  ;;  %v830_v53 = vld [vmem:[%s5422_s5 + $0xa8] sm:$0xff] }
  0xaa   : > { %1037 = vmatprep.subr.mxu0 %v3050_v54  ;;  %1108 = vmatprep.subr.mxu1 %v4067_v0  ;;  %v832_v54 = vld [vmem:[%s5422_s5 + $0xb8] sm:$0xff] }
  0xab   : > { %1038 = vmatpush2.msra.mxu0 %v3049_v55  ;;  %1109 = vmatpush2.msra.mxu1 %v3051_v56  ;;  %v828_v55 = vld [vmem:[%s5422_s5 + $0x98] sm:$0xff]  ;;  %v827_v56 = vld [vmem:[%s5422_s5 + $0x90] sm:$0xff] }
  0xac   : > { %1039 = vmatprep.subr.mxu0 %v3047_v57  ;;  %1110 = vmatprep.subr.mxu1 %v4067_v0  ;;  %v829_v57 = vld [vmem:[%s5422_s5 + $0xa0] sm:$0xff] }
  0xad   : > { %1040 = vmatpush2.msra.mxu0 %v3046_v58  ;;  %1111 = vmatpush2.msra.mxu1 %v3048_v59  ;;  %v825_v58 = vld [vmem:[%s5422_s5 + $0x80] sm:$0xff]  ;;  %v824_v59 = vld [vmem:[%s5422_s5 + $0x78] sm:$0xff] }
  0xae   : > { %1041 = vmatprep.subr.mxu0 %v3044_v60  ;;  %1112 = vmatprep.subr.mxu1 %v4067_v0  ;;  %v826_v60 = vld [vmem:[%s5422_s5 + $0x88] sm:$0xff] }
  0xaf   : > { %1042 = vmatpush2.msra.mxu0 %v3043_v61  ;;  %1113 = vmatpush2.msra.mxu1 %v3045_v62  ;;  %v822_v61 = vld [vmem:[%s5422_s5 + $0x68] sm:$0xff]  ;;  %v821_v62 = vld [vmem:[%s5422_s5 + $0x60] sm:$0xff] }
  0xb0   : > { %1043 = vmatprep.subr.mxu0 %v3041_v63  ;;  %1114 = vmatprep.subr.mxu1 %v4067_v0  ;;  %v823_v63 = vld [vmem:[%s5422_s5 + $0x70] sm:$0xff] }
  0xb1   : > { %1044 = vmatpush2.msra.mxu0 %v3040_v1  ;;  %1115 = vmatpush2.msra.mxu1 %v3042_v2  ;;  %v819_v1 = vld [vmem:[%s5422_s5 + $0x50] sm:$0xff]  ;;  %v818_v2 = vld [vmem:[%s5422_s5 + $0x48] sm:$0xff] }
  0xb2   : > { %1045 = vmatprep.subr.mxu0 %v3038_v3  ;;  %1116 = vmatprep.subr.mxu1 %v4067_v0  ;;  %v820_v3 = vld [vmem:[%s5422_s5 + $0x58] sm:$0xff] }
  0xb3   : > { %1046 = vmatpush2.msra.mxu0 %v3037_v4  ;;  %1117 = vmatpush2.msra.mxu1 %v3039_v5  ;;  %v816_v4 = vld [vmem:[%s5422_s5 + $0x38] sm:$0xff]  ;;  %v815_v5 = vld [vmem:[%s5422_s5 + $0x30] sm:$0xff] }
  0xb4   : > { %1047 = vmatprep.subr.mxu0 %v3035_v6  ;;  %1118 = vmatprep.subr.mxu1 %v4067_v0  ;;  %v817_v6 = vld [vmem:[%s5422_s5 + $0x40] sm:$0xff] }
  0xb5   : > { %1048 = vmatpush2.msra.mxu0 %v3034_v7  ;;  %1119 = vmatpush2.msra.mxu1 %v3036_v8  ;;  %v813_v7 = vld [vmem:[%s5422_s5 + $0x20] sm:$0xff]  ;;  %v812_v8 = vld [vmem:[%s5422_s5 + $0x18] sm:$0xff] }
  0xb6   : > { %1128 = vmatprep.subr.mxu0 %v855_v9  ;;  %1199 = vmatprep.subr.mxu1 %v4067_v0  ;;  %v814_v9 = vld [vmem:[%s5422_s5 + $0x28] sm:$0xff] }
 0x13d   : > { %v715_v16 = vpop.f32.mrf.mxu0  ;;  %v788_v17 = vpop.f32.mrf.mxu1 }
 0x13e   : > { %v789_v18 = vadd.f32 %v788_v17, %v715_v16  ;;  %v891_v16 = vld [vmem:[%s5422_s5 + $0x290] sm:$0xff]  ;;  %v890_v17 = vld [vmem:[%s5422_s5 + $0x288] sm:$0xff] }
 0x13f   : > { %v717_v20 = vpop.f32.mrf.mxu0  ;;  %v790_v21 = vpop.f32.mrf.mxu1 }
 0x140   : > { %v805_v22 = vadd.f32 %v798_v15, %v789_v18  ;;  %v791_v23 = vadd.f32 %v790_v21, %v717_v20  ;;  %v811_v15 = vld [vmem:[%s5422_s5 + $0x10] sm:$0xff]  ;;  %v892_v18 = vld [vmem:[%s5422_s5 + $0x298] sm:$0xff]  ;;  %v889_v21 = vld [vmem:[%s5422_s5 + $0x280] sm:$0xff] }
 0x141   : > { %v887_v20 = vld [vmem:[%s5422_s5 + $0x270] sm:$0xff] }
 0x142   : > { %v806_v24 = vadd.f32 %v802_v19, %v791_v23  ;;  %v4710_v25 = vmax.f32 %v805_v22, 0.0  ;;  %v888_v19 = vld [vmem:[%s5422_s5 + $0x278] sm:$0xff]  ;;  %v885_v22 = vld [vmem:[%s5422_s5 + $0x260] sm:$0xff] }
 0x143   : > { %v884_v23 = vld [vmem:[%s5422_s5 + $0x258] sm:$0xff] }
 0x144   : > { %v808_v26 = vmax.f32 %v806_v24, 0.0  ;;  %v980_v28 = vrot.slane %v4710_v25, 1  ;;  %v886_v24 = vld [vmem:[%s5422_s5 + $0x268] sm:$0xff] }
 0x146   : > { %v981_v27 = vrot.slane %v808_v26, 1 }
 0x148   : > { %3070 = vmatprep.mubr.msk.f32.mxu0 %vm646_vm0, %v981_v27  ;;  %3071 = vmatprep.mubr.msk.f32.mxu1 %vm646_vm0, %v981_v27  ;;  %v881_v27 = vld [vmem:[%s5422_s5 + $0x240] sm:$0xff] }
 0x149   : > { %1050 = vmatmul.mubr.f32.vlgmr.msra.gmra.mxu0 %v980_v28  ;;  %1121 = vmatmul.mubr.f32.vlgmr.msra.gmra.mxu1 %v980_v28  ;;  %v883_v28 = vld [vmem:[%s5422_s5 + $0x250] sm:$0xff] }
 0x14a   : > { %1129 = vmatpush1.msra.mxu0 %v854_v29  ;;  %1200 = vmatpush1.msra.mxu1 %v856_v30  ;;  %v879_v29 = vld [vmem:[%s5422_s5 + $0x230] sm:$0xff]  ;;  %v878_v30 = vld [vmem:[%s5422_s5 + $0x228] sm:$0xff] }
 0x14b   : > { %1130 = vmatprep.subr.mxu0 %v852_v31  ;;  %3072 = vmatprep.mubr.msk.f32.mxu0 %vm646_vm0, %v808_v26  ;;  %v880_v31 = vld [vmem:[%s5422_s5 + $0x238] sm:$0xff] }
 0x14c   : > { %1201 = vmatprep.subr.mxu1 %v4067_v0  ;;  %3073 = vmatprep.mubr.msk.f32.mxu1 %vm646_vm0, %v808_v26  ;;  %v882_v26 = vld [vmem:[%s5422_s5 + $0x248] sm:$0xff] }
 0x14d   : > { %1131 = vmatpush1.msra.mxu0 %v851_v32  ;;  %1202 = vmatpush1.msra.mxu1 %v853_v33  ;;  %v876_v32 = vld [vmem:[%s5422_s5 + $0x218] sm:$0xff]  ;;  %v875_v33 = vld [vmem:[%s5422_s5 + $0x210] sm:$0xff] }
 0x14e   : > { %1132 = vmatprep.subr.mxu0 %v849_v34  ;;  %1203 = vmatprep.subr.mxu1 %v4067_v0  ;;  %v877_v34 = vld [vmem:[%s5422_s5 + $0x220] sm:$0xff] }
 0x14f   : > { %1133 = vmatpush1.msra.mxu0 %v848_v35  ;;  %1204 = vmatpush1.msra.mxu1 %v850_v36  ;;  %v873_v35 = vld [vmem:[%s5422_s5 + $0x200] sm:$0xff]  ;;  %v872_v36 = vld [vmem:[%s5422_s5 + $0x1f8] sm:$0xff] }
 0x150   : > { %1134 = vmatprep.subr.mxu0 %v846_v37  ;;  %1205 = vmatprep.subr.mxu1 %v4067_v0  ;;  %v874_v37 = vld [vmem:[%s5422_s5 + $0x208] sm:$0xff] }
 0x151   : > { %1135 = vmatpush1.msra.mxu0 %v845_v38  ;;  %1206 = vmatpush1.msra.mxu1 %v847_v39  ;;  %v870_v38 = vld [vmem:[%s5422_s5 + $0x1e8] sm:$0xff]  ;;  %v869_v39 = vld [vmem:[%s5422_s5 + $0x1e0] sm:$0xff] }
 0x152   : > { %1136 = vmatprep.subr.mxu0 %v843_v40  ;;  %1207 = vmatprep.subr.mxu1 %v4067_v0  ;;  %v871_v40 = vld [vmem:[%s5422_s5 + $0x1f0] sm:$0xff] }
 0x153   : > { %1137 = vmatpush1.msra.mxu0 %v842_v41  ;;  %1208 = vmatpush1.msra.mxu1 %v844_v42  ;;  %v867_v41 = vld [vmem:[%s5422_s5 + $0x1d0] sm:$0xff]  ;;  %v866_v42 = vld [vmem:[%s5422_s5 + $0x1c8] sm:$0xff] }
 0x154   : > { %1138 = vmatprep.subr.mxu0 %v840_v43  ;;  %1209 = vmatprep.subr.mxu1 %v4067_v0  ;;  %v868_v43 = vld [vmem:[%s5422_s5 + $0x1d8] sm:$0xff] }
 0x155   : > { %1139 = vmatpush1.msra.mxu0 %v839_v44  ;;  %1210 = vmatpush1.msra.mxu1 %v841_v45  ;;  %v864_v44 = vld [vmem:[%s5422_s5 + $0x1b8] sm:$0xff]  ;;  %v863_v45 = vld [vmem:[%s5422_s5 + $0x1b0] sm:$0xff] }
 0x156   : > { %1140 = vmatprep.subr.mxu0 %v837_v46  ;;  %1211 = vmatprep.subr.mxu1 %v4067_v0  ;;  %v865_v46 = vld [vmem:[%s5422_s5 + $0x1c0] sm:$0xff] }
 0x157   : > { %1141 = vmatpush1.msra.mxu0 %v836_v47  ;;  %1212 = vmatpush1.msra.mxu1 %v838_v48  ;;  %v861_v47 = vld [vmem:[%s5422_s5 + $0x1a0] sm:$0xff]  ;;  %v860_v48 = vld [vmem:[%s5422_s5 + $0x198] sm:$0xff] }
 0x158   : > { %1142 = vmatprep.subr.mxu0 %v834_v49  ;;  %1213 = vmatprep.subr.mxu1 %v4067_v0  ;;  %v862_v49 = vld [vmem:[%s5422_s5 + $0x1a8] sm:$0xff] }
 0x159   : > { %1143 = vmatpush1.msra.mxu0 %v833_v50  ;;  %1214 = vmatpush1.msra.mxu1 %v835_v51  ;;  %v858_v50 = vld [vmem:[%s5422_s5 + $0x188] sm:$0xff]  ;;  %v857_v51 = vld [vmem:[%s5422_s5 + $0x180] sm:$0xff] }
 0x15a   : > { %1144 = vmatprep.subr.mxu0 %v831_v52  ;;  %1215 = vmatprep.subr.mxu1 %v4067_v0  ;;  %v859_v52 = vld [vmem:[%s5422_s5 + $0x190] sm:$0xff] }
 0x15b   : > { %1145 = vmatpush1.msra.mxu0 %v830_v53  ;;  %1216 = vmatpush1.msra.mxu1 %v832_v54  ;;  %v1356_v53 = vld [vmem:[#allocation6 + $0x178] sm:$0xff] }
 0x15c   : > { %1146 = vmatprep.subr.mxu0 %v828_v55  ;;  %1217 = vmatprep.subr.mxu1 %v4067_v0  ;;  %v1340_v54 = vld [vmem:[#allocation6 + $0xf8] sm:$0xff]  ;;  %v1355_v55 = vld [vmem:[#allocation6 + $0x170] sm:$0xff] }
 0x15d   : > { %1147 = vmatpush1.msra.mxu0 %v827_v56  ;;  %1218 = vmatpush1.msra.mxu1 %v829_v57  ;;  %v1324_v56 = vld [vmem:[#allocation6 + $0x78] sm:$0xff]  ;;  %v1339_v57 = vld [vmem:[#allocation6 + $0xf0] sm:$0xff] }
 0x15e   : > { %1148 = vmatprep.subr.mxu0 %v825_v58  ;;  %1219 = vmatprep.subr.mxu1 %v4067_v0  ;;  %v1354_v58 = vld [vmem:[#allocation6 + $0x168] sm:$0xff] }
 0x15f   : > { %1149 = vmatpush1.msra.mxu0 %v824_v59  ;;  %1220 = vmatpush1.msra.mxu1 %v826_v60  ;;  %v1323_v59 = vld [vmem:[#allocation6 + $0x70] sm:$0xff]  ;;  %v1338_v60 = vld [vmem:[#allocation6 + $0xe8] sm:$0xff] }
 0x160   : > { %1150 = vmatprep.subr.mxu0 %v822_v61  ;;  %1221 = vmatprep.subr.mxu1 %v4067_v0  ;;  %v1322_v61 = vld [vmem:[#allocation6 + $0x68] sm:$0xff] }
 0x161   : > { %1151 = vmatpush1.msra.mxu0 %v821_v62  ;;  %1222 = vmatpush1.msra.mxu1 %v823_v63  ;;  %v1337_v62 = vld [vmem:[#allocation6 + $0xe0] sm:$0xff] }
 0x162   : > { %1152 = vmatprep.subr.mxu0 %v819_v1  ;;  %1223 = vmatprep.subr.mxu1 %v4067_v0  ;;  %v1321_v63 = vld [vmem:[#allocation6 + $0x60] sm:$0xff]  ;;  %v1352_v1 = vld [vmem:[#allocation6 + $0x158] sm:$0xff] }
 0x163   : > { %1153 = vmatpush1.msra.mxu0 %v818_v2  ;;  %1224 = vmatpush1.msra.mxu1 %v820_v3  ;;  %v1336_v2 = vld [vmem:[#allocation6 + $0xd8] sm:$0xff] }
 0x164   : > { %1154 = vmatprep.subr.mxu0 %v816_v4  ;;  %1225 = vmatprep.subr.mxu1 %v4067_v0  ;;  %v1320_v3 = vld [vmem:[#allocation6 + $0x58] sm:$0xff]  ;;  %v1351_v4 = vld [vmem:[#allocation6 + $0x150] sm:$0xff] }
 0x165   : > { %1155 = vmatpush1.msra.mxu0 %v815_v5  ;;  %1226 = vmatpush1.msra.mxu1 %v817_v6  ;;  %v1335_v5 = vld [vmem:[#allocation6 + $0xd0] sm:$0xff] }
 0x166   : > { %1156 = vmatprep.subr.mxu0 %v813_v7  ;;  %1227 = vmatprep.subr.mxu1 %v4067_v0  ;;  %v1319_v6 = vld [vmem:[#allocation6 + $0x50] sm:$0xff]  ;;  %v1350_v7 = vld [vmem:[#allocation6 + $0x148] sm:$0xff] }
 0x167   : > { %1157 = vmatpush1.msra.mxu0 %v812_v8  ;;  %1228 = vmatpush1.msra.mxu1 %v814_v9  ;;  %v1334_v8 = vld [vmem:[#allocation6 + $0xc8] sm:$0xff] }
 0x168   : > { %1158 = vmatprep.subr.mxu0 %v810_v10  ;;  %1229 = vmatprep.subr.mxu1 %v4067_v0  ;;  %v1318_v9 = vld [vmem:[#allocation6 + $0x48] sm:$0xff]  ;;  %v1349_v10 = vld [vmem:[#allocation6 + $0x140] sm:$0xff] }
 0x169   : > { %1159 = vmatpush1.msra.mxu0 %v809_v13  ;;  %1230 = vmatpush1.msra.mxu1 %v811_v15  ;;  %v1333_v13 = vld [vmem:[#allocation6 + $0xc0] sm:$0xff] }
 0x16a   : > { %1168 = vmatprep.subr.mxu0 %v891_v16  ;;  %1239 = vmatprep.subr.mxu1 %v4067_v0  ;;  %v1317_v15 = vld [vmem:[#allocation6 + $0x40] sm:$0xff]  ;;  %v1348_v16 = vld [vmem:[#allocation6 + $0x138] sm:$0xff] }
 0x16b   : > { %1169 = vmatpush2.msra.mxu0 %v890_v17  ;;  %1240 = vmatpush2.msra.mxu1 %v892_v18  ;;  %v1332_v17 = vld [vmem:[#allocation6 + $0xb8] sm:$0xff] }
 0x16c   : > { %1170 = vmatprep.subr.mxu0 %v888_v19  ;;  %1241 = vmatprep.subr.mxu1 %v4067_v0  ;;  %v1316_v18 = vld [vmem:[#allocation6 + $0x38] sm:$0xff]  ;;  %v1347_v19 = vld [vmem:[#allocation6 + $0x130] sm:$0xff] }
 0x16d   : > { %1171 = vmatpush2.msra.mxu0 %v887_v20  ;;  %1242 = vmatpush2.msra.mxu1 %v889_v21  ;;  %v1331_v20 = vld [vmem:[#allocation6 + $0xb0] sm:$0xff] }
 0x16e   : > { %1172 = vmatprep.subr.mxu0 %v885_v22  ;;  %1243 = vmatprep.subr.mxu1 %v4067_v0  ;;  %v1315_v21 = vld [vmem:[#allocation6 + $0x30] sm:$0xff]  ;;  %v1346_v22 = vld [vmem:[#allocation6 + $0x128] sm:$0xff] }
 0x16f   : > { %1173 = vmatpush2.msra.mxu0 %v884_v23  ;;  %1244 = vmatpush2.msra.mxu1 %v886_v24  ;;  %v1330_v23 = vld [vmem:[#allocation6 + $0xa8] sm:$0xff] }
 0x170   : > { %1174 = vmatprep.subr.mxu0 %v882_v26  ;;  %1245 = vmatprep.subr.mxu1 %v4067_v0  ;;  %v1314_v24 = vld [vmem:[#allocation6 + $0x28] sm:$0xff]  ;;  %v1345_v26 = vld [vmem:[#allocation6 + $0x120] sm:$0xff] }
 0x171   : > { %1175 = vmatpush2.msra.mxu0 %v881_v27  ;;  %1246 = vmatpush2.msra.mxu1 %v883_v28  ;;  %v1329_v27 = vld [vmem:[#allocation6 + $0xa0] sm:$0xff]  ;;  %v1344_v28 = vld [vmem:[#allocation6 + $0x118] sm:$0xff] }
 0x172   : > { %1176 = vmatprep.subr.mxu0 %v879_v29  ;;  %1247 = vmatprep.subr.mxu1 %v4067_v0  ;;  %v1313_v29 = vld [vmem:[#allocation6 + $0x20] sm:$0xff] }
 0x173   : > { %1177 = vmatpush2.msra.mxu0 %v878_v30  ;;  %1248 = vmatpush2.msra.mxu1 %v880_v31  ;;  %v1328_v30 = vld [vmem:[#allocation6 + $0x98] sm:$0xff]  ;;  %v1343_v31 = vld [vmem:[#allocation6 + $0x110] sm:$0xff] }
 0x174   : > { %1178 = vmatprep.subr.mxu0 %v876_v32  ;;  %1249 = vmatprep.subr.mxu1 %v4067_v0  ;;  %v1312_v32 = vld [vmem:[#allocation6 + $0x18] sm:$0xff] }
 0x175   : > { %1179 = vmatpush2.msra.mxu0 %v875_v33  ;;  %1250 = vmatpush2.msra.mxu1 %v877_v34  ;;  %v1327_v33 = vld [vmem:[#allocation6 + $0x90] sm:$0xff]  ;;  %v1342_v34 = vld [vmem:[#allocation6 + $0x108] sm:$0xff] }
 0x176   : > { %1180 = vmatprep.subr.mxu0 %v873_v35  ;;  %1251 = vmatprep.subr.mxu1 %v4067_v0  ;;  %v1311_v35 = vld [vmem:[#allocation6 + $0x10] sm:$0xff] }
 0x177   : > { %1181 = vmatpush2.msra.mxu0 %v872_v36  ;;  %1252 = vmatpush2.msra.mxu1 %v874_v37  ;;  %v1326_v36 = vld [vmem:[#allocation6 + $0x88] sm:$0xff]  ;;  %v1341_v37 = vld [vmem:[#allocation6 + $0x100] sm:$0xff] }
 0x178   : > { %1182 = vmatprep.subr.mxu0 %v870_v38  ;;  %1253 = vmatprep.subr.mxu1 %v4067_v0  ;;  %v1310_v38 = vld [vmem:[#allocation6 + $0x8] sm:$0xff] }
 0x179   : > { %1183 = vmatpush2.msra.mxu0 %v869_v39  ;;  %1254 = vmatpush2.msra.mxu1 %v871_v40  ;;  %v1599_v39 = vld [vmem:[#allocation6 + $0x278] sm:$0xff]  ;;  %v1325_v40 = vld [vmem:[#allocation6 + $0x80] sm:$0xff] }
 0x17a   : > { %1184 = vmatprep.subr.mxu0 %v867_v41  ;;  %1255 = vmatprep.subr.mxu1 %v4067_v0  ;;  %v1309_v41 = vld [vmem:[#allocation6] sm:$0xff] }
 0x17b   : > { %1185 = vmatpush2.msra.mxu0 %v866_v42  ;;  %1256 = vmatpush2.msra.mxu1 %v868_v43 }
 0x17c   : > { %1186 = vmatprep.subr.mxu0 %v864_v44  ;;  %1257 = vmatprep.subr.mxu1 %v4067_v0 }
 0x17d   : > { %1187 = vmatpush2.msra.mxu0 %v863_v45  ;;  %1258 = vmatpush2.msra.mxu1 %v865_v46  ;;  %v1281_v45 = vsub.s32 2, %v4702_v11  ;;  %v1269_v46 = vld [vmem:[#allocation4] sm:$0x7]  ;;  %v1308_v11 = vld [vmem:[%s5425_s8 + $0x78] sm:$0xff] }
 0x17e   : > { %1188 = vmatprep.subr.mxu0 %v861_v47  ;;  %1259 = vmatprep.subr.mxu1 %v4067_v0 }
 0x17f   : > { %1189 = vmatpush2.msra.mxu0 %v860_v48  ;;  %1260 = vmatpush2.msra.mxu1 %v862_v49  ;;  %v1282_v48 = vrot.slane %v1269_v46, %v1281_v45  ;;  %v1584_v45 = vld [vmem:[#allocation6 + $0x200] sm:$0xff] }
 0x180   : > { %1190 = vmatprep.subr.mxu0 %v858_v50  ;;  %1261 = vmatprep.subr.mxu1 %v4067_v0  ;;  %v1274_v50 = vrot.slane %v1269_v46, %v797_v12  ;;  %v1582_v12 = vld [vmem:[#allocation6 + $0x1f0] sm:$0xff] }
 0x181   : > { %1191 = vmatpush2.msra.mxu0 %v857_v51  ;;  %1262 = vmatpush2.msra.mxu1 %v859_v52 }
 0x182   : > { %1193 = vmatmul.mubr.f32.vlgmr.msra.gmra.mxu0 %v4710_v25  ;;  %1264 = vmatmul.mubr.f32.vlgmr.msra.gmra.mxu1 %v4710_v25  ;;  %v1353_v25 = vld [vmem:[#allocation6 + $0x160] sm:$0xff] }
 0x183   : > { %3456 = vmatprep.subr.mxu1 %v4067_v0  ;;  %3076 = vmatprep.subr.mxu0 %v1340_v54  ;;  %v1278_v54 = vrot.slane %v1269_v46, %v801_v14  ;;  %v1597_v14 = vld [vmem:[#allocation6 + $0x268] sm:$0xff]  ;;  %v1568_v46 = vld [vmem:[#allocation6 + $0x180] sm:$0xff] }
 0x184   : > { %3457 = vmatpush3.msra.mxu1 %v1356_v53  ;;  %3077 = vmatpush3.msra.mxu0 %v1324_v56 }
 0x185   : > { %3458 = vmatprep.subr.mxu1 %v4067_v0  ;;  %3078 = vmatprep.subr.mxu0 %v1339_v57 }
 0x186   : > { %3459 = vmatpush3.msra.mxu1 %v1355_v55  ;;  %3079 = vmatpush3.msra.mxu0 %v1323_v59 }
 0x187   : > { %3460 = vmatprep.subr.mxu1 %v4067_v0  ;;  %3080 = vmatprep.subr.mxu0 %v1338_v60 }
 0x188   : > { %3461 = vmatpush3.msra.mxu1 %v1354_v58  ;;  %3081 = vmatpush3.msra.mxu0 %v1322_v61 }
 0x189   : > { %3462 = vmatprep.subr.mxu1 %v4067_v0  ;;  %3082 = vmatprep.subr.mxu0 %v1337_v62  ;;  %v1598_v62 = vld [vmem:[#allocation6 + $0x270] sm:$0xff] }
 0x18a   : > { %3463 = vmatpush3.msra.mxu1 %v1353_v25  ;;  %3083 = vmatpush3.msra.mxu0 %v1321_v63  ;;  %v1583_v25 = vld [vmem:[#allocation6 + $0x1f8] sm:$0xff] }
 0x18b   : > { %3464 = vmatprep.subr.mxu1 %v4067_v0  ;;  %3084 = vmatprep.subr.mxu0 %v1336_v2  ;;  %v1581_v2 = vld [vmem:[#allocation6 + $0x1e8] sm:$0xff] }
 0x18c   : > { %3465 = vmatpush3.msra.mxu1 %v1352_v1  ;;  %3085 = vmatpush3.msra.mxu0 %v1320_v3 }
 0x18d   : > { %3466 = vmatprep.subr.mxu1 %v4067_v0  ;;  %3086 = vmatprep.subr.mxu0 %v1335_v5  ;;  %v1596_v5 = vld [vmem:[#allocation6 + $0x260] sm:$0xff] }
 0x18e   : > { %3467 = vmatpush3.msra.mxu1 %v1351_v4  ;;  %3087 = vmatpush3.msra.mxu0 %v1319_v6  ;;  %v1307_v4 = vld [vmem:[%s5425_s8 + $0x70] sm:$0xff]  ;;  %v1580_v6 = vld [vmem:[#allocation6 + $0x1e0] sm:$0xff] }
 0x18f   : > { %3468 = vmatprep.subr.mxu1 %v4067_v0  ;;  %3088 = vmatprep.subr.mxu0 %v1334_v8  ;;  %v1595_v8 = vld [vmem:[#allocation6 + $0x258] sm:$0xff] }
 0x190   : > { %3469 = vmatpush3.msra.mxu1 %v1350_v7  ;;  %3089 = vmatpush3.msra.mxu0 %v1318_v9  ;;  %v1306_v7 = vld [vmem:[%s5425_s8 + $0x68] sm:$0xff]  ;;  %v1579_v9 = vld [vmem:[#allocation6 + $0x1d8] sm:$0xff] }
 0x191   : > { %3470 = vmatprep.subr.mxu1 %v4067_v0  ;;  %3090 = vmatprep.subr.mxu0 %v1333_v13  ;;  %v1594_v13 = vld [vmem:[#allocation6 + $0x250] sm:$0xff] }
 0x192   : > { %3471 = vmatpush3.msra.mxu1 %v1349_v10  ;;  %3091 = vmatpush3.msra.mxu0 %v1317_v15  ;;  %v1305_v10 = vld [vmem:[%s5425_s8 + $0x60] sm:$0xff]  ;;  %v1578_v15 = vld [vmem:[#allocation6 + $0x1d0] sm:$0xff] }
 0x193   : > { %3472 = vmatprep.subr.mxu1 %v4067_v0  ;;  %3092 = vmatprep.subr.mxu0 %v1332_v17  ;;  %v1593_v17 = vld [vmem:[#allocation6 + $0x248] sm:$0xff] }
 0x194   : > { %3473 = vmatpush3.msra.mxu1 %v1348_v16  ;;  %3093 = vmatpush3.msra.mxu0 %v1316_v18  ;;  %v1304_v16 = vld [vmem:[%s5425_s8 + $0x58] sm:$0xff]  ;;  %v1577_v18 = vld [vmem:[#allocation6 + $0x1c8] sm:$0xff] }
 0x195   : > { %3474 = vmatprep.subr.mxu1 %v4067_v0  ;;  %3094 = vmatprep.subr.mxu0 %v1331_v20  ;;  %v1592_v20 = vld [vmem:[#allocation6 + $0x240] sm:$0xff] }
 0x196   : > { %3475 = vmatpush3.msra.mxu1 %v1347_v19  ;;  %3095 = vmatpush3.msra.mxu0 %v1315_v21  ;;  %v1303_v19 = vld [vmem:[%s5425_s8 + $0x50] sm:$0xff]  ;;  %v1576_v21 = vld [vmem:[#allocation6 + $0x1c0] sm:$0xff] }
 0x197   : > { %3476 = vmatprep.subr.mxu1 %v4067_v0  ;;  %3096 = vmatprep.subr.mxu0 %v1330_v23  ;;  %v1591_v23 = vld [vmem:[#allocation6 + $0x238] sm:$0xff] }
 0x198   : > { %3477 = vmatpush3.msra.mxu1 %v1346_v22  ;;  %3097 = vmatpush3.msra.mxu0 %v1314_v24  ;;  %v1302_v22 = vld [vmem:[%s5425_s8 + $0x48] sm:$0xff]  ;;  %v1575_v24 = vld [vmem:[#allocation6 + $0x1b8] sm:$0xff] }
 0x199   : > { %3478 = vmatprep.subr.mxu1 %v4067_v0  ;;  %3098 = vmatprep.subr.mxu0 %v1329_v27  ;;  %v1590_v27 = vld [vmem:[#allocation6 + $0x230] sm:$0xff] }
 0x19a   : > { %3479 = vmatpush3.msra.mxu1 %v1345_v26  ;;  %3099 = vmatpush3.msra.mxu0 %v1313_v29  ;;  %v1301_v26 = vld [vmem:[%s5425_s8 + $0x40] sm:$0xff]  ;;  %v1300_v29 = vld [vmem:[%s5425_s8 + $0x38] sm:$0xff] }
 0x19b   : > { %3480 = vmatprep.subr.mxu1 %v4067_v0  ;;  %3100 = vmatprep.subr.mxu0 %v1328_v30  ;;  %v1589_v30 = vld [vmem:[#allocation6 + $0x228] sm:$0xff] }
 0x19c   : > { %3481 = vmatpush3.msra.mxu1 %v1344_v28  ;;  %3101 = vmatpush3.msra.mxu0 %v1312_v32  ;;  %v1574_v28 = vld [vmem:[#allocation6 + $0x1b0] sm:$0xff] }
 0x19d   : > { %3482 = vmatprep.subr.mxu1 %v4067_v0  ;;  %3102 = vmatprep.subr.mxu0 %v1327_v33  ;;  %v1299_v32 = vld [vmem:[%s5425_s8 + $0x30] sm:$0xff]  ;;  %v1588_v33 = vld [vmem:[#allocation6 + $0x220] sm:$0xff] }
 0x19e   : > { %3483 = vmatpush3.msra.mxu1 %v1343_v31  ;;  %3103 = vmatpush3.msra.mxu0 %v1311_v35  ;;  %v1573_v31 = vld [vmem:[#allocation6 + $0x1a8] sm:$0xff] }
 0x19f   : > { %3484 = vmatprep.subr.mxu1 %v4067_v0  ;;  %3104 = vmatprep.subr.mxu0 %v1326_v36  ;;  %v1298_v35 = vld [vmem:[%s5425_s8 + $0x28] sm:$0xff]  ;;  %v1587_v36 = vld [vmem:[#allocation6 + $0x218] sm:$0xff] }
 0x1a0   : > { %3485 = vmatpush3.msra.mxu1 %v1342_v34  ;;  %3105 = vmatpush3.msra.mxu0 %v1310_v38  ;;  %v1572_v34 = vld [vmem:[#allocation6 + $0x1a0] sm:$0xff] }
 0x1a1   : > { %3486 = vmatprep.subr.mxu1 %v4067_v0  ;;  %3488 = vmatprep.mubr.msk.f32.mxu1 %vm4068_vm1, %v4067_v0  ;;  %v1297_v38 = vld [vmem:[%s5425_s8 + $0x20] sm:$0xff] }
 0x1a2   : > { %3487 = vmatpush3.msra.mxu1 %v1341_v37  ;;  %3106 = vmatprep.subr.mxu0 %v1325_v40  ;;  %v1571_v37 = vld [vmem:[#allocation6 + $0x198] sm:$0xff]  ;;  %v1570_v40 = vld [vmem:[#allocation6 + $0x190] sm:$0xff] }
 0x1a3   : > { %3145 = vmatprep.subr.mxu1 %v1599_v39  ;;  %3107 = vmatpush3.msra.mxu0 %v1309_v41  ;;  %v1586_v39 = vld [vmem:[#allocation6 + $0x210] sm:$0xff] }
 0x1a4   : > { %3491 = vmatprep.subr.mxu0 %v4067_v0  ;;  %v1296_v41 = vld [vmem:[%s5425_s8 + $0x18] sm:$0xff] }
 0x209   : > { %v1122_v42 = vpop.f32.mrf.mxu1  ;;  %v1051_v44 = vpop.f32.mrf.mxu0 }
 0x20b   : > { %v1124_v43 = vpop.f32.mrf.mxu1  ;;  %v1053_v47 = vpop.f32.mrf.mxu0 }
 0x20c   : > { %v1569_v43 = vld [vmem:[#allocation6 + $0x188] sm:$0xff] }
 0x242   : > { %v1194_v49 = vpop.f32.mrf.mxu0  ;;  %v1265_v51 = vpop.f32.mrf.mxu1 }
 0x243   : > { %v1195_v52 = vadd.f32 %v1194_v49, %v1051_v44  ;;  %v1266_v53 = vadd.f32 %v1265_v51, %v1122_v42  ;;  %v1585_v42 = vld [vmem:[#allocation6 + $0x208] sm:$0xff]  ;;  %v1293_v51 = vld [vmem:[%s5425_s8] sm:$0xff] }
 0x244   : > { %v1196_v55 = vpop.f32.mrf.mxu0  ;;  %v1267_v56 = vpop.f32.mrf.mxu1  ;;  %v1295_v44 = vld [vmem:[%s5425_s8 + $0x10] sm:$0xff] }
 0x245   : > { %v1288_v57 = vadd.f32 %v1282_v48, %v1266_v53  ;;  %v1197_v58 = vadd.f32 %v1196_v55, %v1053_v47  ;;  %v1286_v59 = vadd.f32 %v1274_v50, %v1195_v52  ;;  %v1294_v47 = vld [vmem:[%s5425_s8 + $0x8] sm:$0xff]  ;;  %v1798_v48 = vld [vmem:[#allocation6 + $0x3f8] sm:$0xff]  ;;  %v1797_v53 = vld [vmem:[#allocation6 + $0x3f0] sm:$0xff] }
 0x246   : > { %v1782_v50 = vld [vmem:[#allocation6 + $0x378] sm:$0xff]  ;;  %v1781_v55 = vld [vmem:[#allocation6 + $0x370] sm:$0xff] }
 0x247   : > { %v5019_v60 = vmax.f32 %v1288_v57, 0.0  ;;  %v1287_v61 = vadd.f32 %v1278_v54, %v1197_v58  ;;  %v5024_v1 = vmax.f32 %v1286_v59, 0.0  ;;  %v1292_v54 = vld [vmem:[%s587_s16] sm:$0x1]  ;;  %v1796_v57 = vld [vmem:[#allocation6 + $0x3e8] sm:$0xff]  ;;  %v1614_v59 = vld [vmem:[#allocation6 + $0x2f0] sm:$0xff] }
 0x248   : > { %v1615_v56 = vld [vmem:[#allocation6 + $0x2f8] sm:$0xff]  ;;  %v1780_v58 = vld [vmem:[#allocation6 + $0x368] sm:$0xff] }
 0x249   : > { %v5021_v63 = vmax.f32 %v1287_v61, 0.0  ;;  %3489 = vmatmul.mubr.f32.vlgmr.msra.gmra.mxu1 %v5019_v60  ;;  %v1619_v49 = vrot.slane %v5024_v1, 1  ;;  %v1795_v61 = vld [vmem:[#allocation6 + $0x3e0] sm:$0xff] }
 0x24a   : > { %3146 = vmatpush3.msra.mxu1 %v1583_v25  ;;  %v1779_v25 = vld [vmem:[#allocation6 + $0x360] sm:$0xff] }
 0x24b   : > { %3147 = vmatprep.subr.mxu1 %v1598_v62  ;;  %1421 = vmatprep.mubr.f32.mxu0 %v5021_v63  ;;  %v1620_v3 = vrot.slane %v5021_v63, 1  ;;  %v1816_v52 = vrot.slane %v5021_v63, 2  ;;  %v1613_v62 = vld [vmem:[#allocation6 + $0x2e8] sm:$0xff] }
 0x24c   : > { %3148 = vmatpush3.msra.mxu1 %v1582_v12  ;;  %1422 = vmatmul.mubr.f32.vlgmr.msra.gmra.mxu0 %v5024_v1  ;;  %v1794_v12 = vld [vmem:[#allocation6 + $0x3d8] sm:$0xff] }
 0x24d   : > { %3492 = vmatpush3.msra.mxu0 %v1308_v11  ;;  %3149 = vmatprep.subr.mxu1 %v1597_v14  ;;  %v1778_v11 = vld [vmem:[#allocation6 + $0x358] sm:$0xff]  ;;  %v1612_v14 = vld [vmem:[#allocation6 + $0x2e0] sm:$0xff] }
 0x24e   : > { %3493 = vmatprep.subr.mxu0 %v4067_v0  ;;  %3150 = vmatpush3.msra.mxu1 %v1581_v2  ;;  %v1793_v2 = vld [vmem:[#allocation6 + $0x3d0] sm:$0xff] }
 0x24f   : > { %1689 = vmatprep.mubr.f32.mxu1 %v1620_v3  ;;  %3494 = vmatpush3.msra.mxu0 %v1307_v4  ;;  %v1777_v3 = vld [vmem:[#allocation6 + $0x350] sm:$0xff]  ;;  %v1611_v4 = vld [vmem:[#allocation6 + $0x2d8] sm:$0xff] }
 0x250   : > { %3151 = vmatprep.subr.mxu1 %v1596_v5  ;;  %3495 = vmatprep.subr.mxu0 %v4067_v0  ;;  %v1792_v5 = vld [vmem:[#allocation6 + $0x3c8] sm:$0xff] }
 0x251   : > { %3152 = vmatpush3.msra.mxu1 %v1580_v6  ;;  %3496 = vmatpush3.msra.mxu0 %v1306_v7  ;;  %v1776_v6 = vld [vmem:[#allocation6 + $0x348] sm:$0xff]  ;;  %v1610_v7 = vld [vmem:[#allocation6 + $0x2d0] sm:$0xff] }
 0x252   : > { %3153 = vmatprep.subr.mxu1 %v1595_v8  ;;  %3497 = vmatprep.subr.mxu0 %v4067_v0  ;;  %v1791_v8 = vld [vmem:[#allocation6 + $0x3c0] sm:$0xff] }
 0x253   : > { %3154 = vmatpush3.msra.mxu1 %v1579_v9  ;;  %3498 = vmatpush3.msra.mxu0 %v1305_v10  ;;  %v1775_v9 = vld [vmem:[#allocation6 + $0x340] sm:$0xff]  ;;  %v1609_v10 = vld [vmem:[#allocation6 + $0x2c8] sm:$0xff] }
 0x254   : > { %3155 = vmatprep.subr.mxu1 %v1594_v13  ;;  %3499 = vmatprep.subr.mxu0 %v4067_v0  ;;  %v1790_v13 = vld [vmem:[#allocation6 + $0x3b8] sm:$0xff] }
 0x255   : > { %3156 = vmatpush3.msra.mxu1 %v1578_v15  ;;  %3500 = vmatpush3.msra.mxu0 %v1304_v16  ;;  %v1774_v15 = vld [vmem:[#allocation6 + $0x338] sm:$0xff]  ;;  %v1608_v16 = vld [vmem:[#allocation6 + $0x2c0] sm:$0xff] }
 0x256   : > { %3157 = vmatprep.subr.mxu1 %v1593_v17  ;;  %3501 = vmatprep.subr.mxu0 %v4067_v0  ;;  %v1789_v17 = vld [vmem:[#allocation6 + $0x3b0] sm:$0xff] }
 0x257   : > { %3158 = vmatpush3.msra.mxu1 %v1577_v18  ;;  %3502 = vmatpush3.msra.mxu0 %v1303_v19  ;;  %v1773_v18 = vld [vmem:[#allocation6 + $0x330] sm:$0xff]  ;;  %v1607_v19 = vld [vmem:[#allocation6 + $0x2b8] sm:$0xff] }
 0x258   : > { %3159 = vmatprep.subr.mxu1 %v1592_v20  ;;  %3503 = vmatprep.subr.mxu0 %v4067_v0  ;;  %v1788_v20 = vld [vmem:[#allocation6 + $0x3a8] sm:$0xff] }
 0x259   : > { %3160 = vmatpush3.msra.mxu1 %v1576_v21  ;;  %3504 = vmatpush3.msra.mxu0 %v1302_v22  ;;  %v1772_v21 = vld [vmem:[#allocation6 + $0x328] sm:$0xff]  ;;  %v1606_v22 = vld [vmem:[#allocation6 + $0x2b0] sm:$0xff] }
 0x25a   : > { %3161 = vmatprep.subr.mxu1 %v1591_v23  ;;  %3505 = vmatprep.subr.mxu0 %v4067_v0  ;;  %v1787_v23 = vld [vmem:[#allocation6 + $0x3a0] sm:$0xff] }
 0x25b   : > { %3162 = vmatpush3.msra.mxu1 %v1575_v24  ;;  %3506 = vmatpush3.msra.mxu0 %v1301_v26  ;;  %v1771_v24 = vld [vmem:[#allocation6 + $0x320] sm:$0xff]  ;;  %v1605_v26 = vld [vmem:[#allocation6 + $0x2a8] sm:$0xff] }
 0x25c   : > { %3163 = vmatprep.subr.mxu1 %v1590_v27  ;;  %3507 = vmatprep.subr.mxu0 %v4067_v0  ;;  %v1786_v27 = vld [vmem:[#allocation6 + $0x398] sm:$0xff] }
 0x25d   : > { %3164 = vmatpush3.msra.mxu1 %v1574_v28  ;;  %3508 = vmatpush3.msra.mxu0 %v1300_v29  ;;  %v1770_v28 = vld [vmem:[#allocation6 + $0x318] sm:$0xff]  ;;  %v1604_v29 = vld [vmem:[#allocation6 + $0x2a0] sm:$0xff] }
 0x25e   : > { %3165 = vmatprep.subr.mxu1 %v1589_v30  ;;  %3509 = vmatprep.subr.mxu0 %v4067_v0  ;;  %v1785_v30 = vld [vmem:[#allocation6 + $0x390] sm:$0xff] }
 0x25f   : > { %3166 = vmatpush3.msra.mxu1 %v1573_v31  ;;  %3510 = vmatpush3.msra.mxu0 %v1299_v32  ;;  %v1769_v31 = vld [vmem:[#allocation6 + $0x310] sm:$0xff]  ;;  %v1603_v32 = vld [vmem:[#allocation6 + $0x298] sm:$0xff] }
 0x260   : > { %3167 = vmatprep.subr.mxu1 %v1588_v33  ;;  %3511 = vmatprep.subr.mxu0 %v4067_v0  ;;  %v1784_v33 = vld [vmem:[#allocation6 + $0x388] sm:$0xff] }
 0x261   : > { %3168 = vmatpush3.msra.mxu1 %v1572_v34  ;;  %3512 = vmatpush3.msra.mxu0 %v1298_v35  ;;  %v1768_v34 = vld [vmem:[#allocation6 + $0x308] sm:$0xff]  ;;  %v1602_v35 = vld [vmem:[#allocation6 + $0x290] sm:$0xff] }
 0x262   : > { %3169 = vmatprep.subr.mxu1 %v1587_v36  ;;  %3513 = vmatprep.subr.mxu0 %v4067_v0  ;;  %v1783_v36 = vld [vmem:[#allocation6 + $0x380] sm:$0xff] }
 0x263   : > { %3170 = vmatpush3.msra.mxu1 %v1571_v37  ;;  %3514 = vmatpush3.msra.mxu0 %v1297_v38  ;;  %v1767_v37 = vld [vmem:[#allocation6 + $0x300] sm:$0xff]  ;;  %v1601_v38 = vld [vmem:[#allocation6 + $0x288] sm:$0xff] }
 0x264   : > { %3171 = vmatprep.subr.mxu1 %v1586_v39  ;;  %3515 = vmatprep.subr.mxu0 %v4067_v0  ;;  %v1994_v39 = vld [vmem:[#allocation6 + $0x578] sm:$0xff] }
 0x265   : > { %3172 = vmatpush3.msra.mxu1 %v1570_v40  ;;  %3516 = vmatpush3.msra.mxu0 %v1296_v41  ;;  %v1815_v40 = vrot.slane %v5024_v1, 2  ;;  %v1978_v41 = vld [vmem:[#allocation6 + $0x4f8] sm:$0xff] }
 0x266   : > { %3173 = vmatprep.subr.mxu1 %v1585_v42  ;;  %3517 = vmatprep.subr.mxu0 %v4067_v0  ;;  %v1600_v42 = vld [vmem:[#allocation6 + $0x280] sm:$0xff] }
 0x267   : > { %3174 = vmatpush3.msra.mxu1 %v1569_v43  ;;  %3518 = vmatpush3.msra.mxu0 %v1295_v44  ;;  %v2012_v43 = vrot.slane %v5021_v63, 3  ;;  %v1993_v44 = vld [vmem:[#allocation6 + $0x570] sm:$0xff] }
 0x268   : > { %3175 = vmatprep.subr.mxu1 %v1584_v45  ;;  %3519 = vmatprep.subr.mxu0 %v4067_v0  ;;  %v1621_v45 = vrot.slane %v5019_v60, 1 }
 0x269   : > { %3176 = vmatpush3.msra.mxu1 %v1568_v46  ;;  %3520 = vmatpush3.msra.mxu0 %v1294_v47  ;;  %v1977_v46 = vld [vmem:[#allocation6 + $0x4f0] sm:$0xff]  ;;  %v1814_v47 = vld [vmem:[#allocation6 + $0x478] sm:$0xff] }
 0x26a   : > { %1690 = vmatmul.mubr.f32.vlgmr.msra.gmra.mxu1 %v1619_v49  ;;  %3197 = vmatprep.subr.mxu1 %v1798_v48  ;;  %v1992_v48 = vld [vmem:[#allocation6 + $0x568] sm:$0xff] }
 0x26b   : > { %3521 = vmatprep.subr.mxu0 %v4067_v0  ;;  %3198 = vmatpush3.msra.mxu1 %v1782_v50  ;;  %v1976_v49 = vld [vmem:[#allocation6 + $0x4e8] sm:$0xff]  ;;  %v1813_v50 = vld [vmem:[#allocation6 + $0x470] sm:$0xff] }
 0x26c   : > { %1885 = vmatprep.mubr.f32.mxu1 %v1816_v52  ;;  %3522 = vmatpush3.msra.mxu0 %v1293_v51  ;;  %v1991_v51 = vld [vmem:[#allocation6 + $0x560] sm:$0xff] }
 0x26d   : > { %3523 = vmatprep.mubr.msk.f32.mxu0 %vm4068_vm1, %v4067_v0  ;;  %3199 = vmatprep.subr.mxu1 %v1797_v53  ;;  %v1975_v52 = vld [vmem:[#allocation6 + $0x4e0] sm:$0xff]  ;;  %v1812_v53 = vld [vmem:[#allocation6 + $0x468] sm:$0xff] }
 0x26e   : > { %3524 = vmatmul.mubr.f32.vlgmr.msra.gmra.mxu0 %v1292_v54  ;;  %3526 = vmatprep.subr.mxu0 %v4067_v0  ;;  %v1990_v54 = vld [vmem:[#allocation6 + $0x558] sm:$0xff] }
 0x26f   : > { %3200 = vmatpush3.msra.mxu1 %v1781_v55  ;;  %3527 = vmatpush3.msra.mxu0 %v1615_v56  ;;  %v1974_v55 = vld [vmem:[#allocation6 + $0x4d8] sm:$0xff]  ;;  %v1811_v56 = vld [vmem:[#allocation6 + $0x460] sm:$0xff] }
 0x270   : > { %3201 = vmatprep.subr.mxu1 %v1796_v57  ;;  %3528 = vmatprep.subr.mxu0 %v4067_v0  ;;  %v1989_v57 = vld [vmem:[#allocation6 + $0x550] sm:$0xff] }
 0x271   : > { %3202 = vmatpush3.msra.mxu1 %v1780_v58  ;;  %3529 = vmatpush3.msra.mxu0 %v1614_v59  ;;  %v1973_v58 = vld [vmem:[#allocation6 + $0x4d0] sm:$0xff]  ;;  %v1810_v59 = vld [vmem:[#allocation6 + $0x458] sm:$0xff] }
 0x272   : > { %3203 = vmatprep.subr.mxu1 %v1795_v61  ;;  %3530 = vmatprep.subr.mxu0 %v4067_v0  ;;  %v1988_v61 = vld [vmem:[#allocation6 + $0x548] sm:$0xff] }
 0x273   : > { %3204 = vmatpush3.msra.mxu1 %v1779_v25  ;;  %3531 = vmatpush3.msra.mxu0 %v1613_v62  ;;  %v1972_v25 = vld [vmem:[#allocation6 + $0x4c8] sm:$0xff]  ;;  %v1809_v62 = vld [vmem:[#allocation6 + $0x450] sm:$0xff] }
 0x274   : > { %3205 = vmatprep.subr.mxu1 %v1794_v12  ;;  %3532 = vmatprep.subr.mxu0 %v4067_v0  ;;  %v1987_v12 = vld [vmem:[#allocation6 + $0x540] sm:$0xff] }
 0x275   : > { %3206 = vmatpush3.msra.mxu1 %v1778_v11  ;;  %3533 = vmatpush3.msra.mxu0 %v1612_v14  ;;  %v1971_v11 = vld [vmem:[#allocation6 + $0x4c0] sm:$0xff]  ;;  %v1808_v14 = vld [vmem:[#allocation6 + $0x448] sm:$0xff] }
 0x276   : > { %3207 = vmatprep.subr.mxu1 %v1793_v2  ;;  %3534 = vmatprep.subr.mxu0 %v4067_v0  ;;  %v1986_v2 = vld [vmem:[#allocation6 + $0x538] sm:$0xff] }
 0x277   : > { %3208 = vmatpush3.msra.mxu1 %v1777_v3  ;;  %3535 = vmatpush3.msra.mxu0 %v1611_v4  ;;  %v1970_v3 = vld [vmem:[#allocation6 + $0x4b8] sm:$0xff]  ;;  %v1807_v4 = vld [vmem:[#allocation6 + $0x440] sm:$0xff] }
 0x278   : > { %3209 = vmatprep.subr.mxu1 %v1792_v5  ;;  %3536 = vmatprep.subr.mxu0 %v4067_v0  ;;  %v1985_v5 = vld [vmem:[#allocation6 + $0x530] sm:$0xff] }
 0x279   : > { %3210 = vmatpush3.msra.mxu1 %v1776_v6  ;;  %3537 = vmatpush3.msra.mxu0 %v1610_v7  ;;  %v1969_v6 = vld [vmem:[#allocation6 + $0x4b0] sm:$0xff]  ;;  %v1806_v7 = vld [vmem:[#allocation6 + $0x438] sm:$0xff] }
 0x27a   : > { %3211 = vmatprep.subr.mxu1 %v1791_v8  ;;  %3538 = vmatprep.subr.mxu0 %v4067_v0  ;;  %v1984_v8 = vld [vmem:[#allocation6 + $0x528] sm:$0xff] }
 0x27b   : > { %3212 = vmatpush3.msra.mxu1 %v1775_v9  ;;  %3539 = vmatpush3.msra.mxu0 %v1609_v10  ;;  %v1968_v9 = vld [vmem:[#allocation6 + $0x4a8] sm:$0xff]  ;;  %v1805_v10 = vld [vmem:[#allocation6 + $0x430] sm:$0xff] }
 0x27c   : > { %3213 = vmatprep.subr.mxu1 %v1790_v13  ;;  %3540 = vmatprep.subr.mxu0 %v4067_v0  ;;  %v1983_v13 = vld [vmem:[#allocation6 + $0x520] sm:$0xff] }
 0x27d   : > { %3214 = vmatpush3.msra.mxu1 %v1774_v15  ;;  %3541 = vmatpush3.msra.mxu0 %v1608_v16  ;;  %v1967_v15 = vld [vmem:[#allocation6 + $0x4a0] sm:$0xff]  ;;  %v1804_v16 = vld [vmem:[#allocation6 + $0x428] sm:$0xff] }
 0x27e   : > { %3215 = vmatprep.subr.mxu1 %v1789_v17  ;;  %3542 = vmatprep.subr.mxu0 %v4067_v0  ;;  %v1982_v17 = vld [vmem:[#allocation6 + $0x518] sm:$0xff] }
 0x27f   : > { %3216 = vmatpush3.msra.mxu1 %v1773_v18  ;;  %3543 = vmatpush3.msra.mxu0 %v1607_v19  ;;  %v1966_v18 = vld [vmem:[#allocation6 + $0x498] sm:$0xff]  ;;  %v1803_v19 = vld [vmem:[#allocation6 + $0x420] sm:$0xff] }
 0x280   : > { %3217 = vmatprep.subr.mxu1 %v1788_v20  ;;  %3544 = vmatprep.subr.mxu0 %v4067_v0  ;;  %v1981_v20 = vld [vmem:[#allocation6 + $0x510] sm:$0xff] }
 0x281   : > { %3218 = vmatpush3.msra.mxu1 %v1772_v21  ;;  %3545 = vmatpush3.msra.mxu0 %v1606_v22  ;;  %v1965_v21 = vld [vmem:[#allocation6 + $0x490] sm:$0xff]  ;;  %v1802_v22 = vld [vmem:[#allocation6 + $0x418] sm:$0xff] }
 0x282   : > { %3219 = vmatprep.subr.mxu1 %v1787_v23  ;;  %3546 = vmatprep.subr.mxu0 %v4067_v0  ;;  %v1980_v23 = vld [vmem:[#allocation6 + $0x508] sm:$0xff] }
 0x283   : > { %3220 = vmatpush3.msra.mxu1 %v1771_v24  ;;  %3547 = vmatpush3.msra.mxu0 %v1605_v26  ;;  %v1964_v24 = vld [vmem:[#allocation6 + $0x488] sm:$0xff]  ;;  %v1801_v26 = vld [vmem:[#allocation6 + $0x410] sm:$0xff] }
 0x284   : > { %3221 = vmatprep.subr.mxu1 %v1786_v27  ;;  %3548 = vmatprep.subr.mxu0 %v4067_v0  ;;  %v1979_v27 = vld [vmem:[#allocation6 + $0x500] sm:$0xff] }
 0x285   : > { %3222 = vmatpush3.msra.mxu1 %v1770_v28  ;;  %3549 = vmatpush3.msra.mxu0 %v1604_v29  ;;  %v1963_v28 = vld [vmem:[#allocation6 + $0x480] sm:$0xff]  ;;  %v1800_v29 = vld [vmem:[#allocation6 + $0x408] sm:$0xff] }
 0x286   : > { %3223 = vmatprep.subr.mxu1 %v1785_v30  ;;  %3550 = vmatprep.subr.mxu0 %v4067_v0  ;;  %v2190_v30 = vld [vmem:[#allocation6 + $0x6f8] sm:$0xff] }
 0x287   : > { %3224 = vmatpush3.msra.mxu1 %v1769_v31  ;;  %3551 = vmatpush3.msra.mxu0 %v1603_v32  ;;  %v2011_v31 = vrot.slane %v5024_v1, 3  ;;  %v2174_v32 = vld [vmem:[#allocation6 + $0x678] sm:$0xff] }
 0x288   : > { %3225 = vmatprep.subr.mxu1 %v1784_v33  ;;  %3552 = vmatprep.subr.mxu0 %v4067_v0  ;;  %v1799_v33 = vld [vmem:[#allocation6 + $0x400] sm:$0xff] }
 0x289   : > { %3226 = vmatpush3.msra.mxu1 %v1768_v34  ;;  %3553 = vmatpush3.msra.mxu0 %v1602_v35  ;;  %v2208_v34 = vrot.slane %v5021_v63, 4  ;;  %v2189_v35 = vld [vmem:[#allocation6 + $0x6f0] sm:$0xff] }
 0x28a   : > { %3227 = vmatprep.subr.mxu1 %v1783_v36  ;;  %3554 = vmatprep.subr.mxu0 %v4067_v0  ;;  %v1817_v36 = vrot.slane %v5019_v60, 2 }
 0x28b   : > { %3228 = vmatpush3.msra.mxu1 %v1767_v37  ;;  %3555 = vmatpush3.msra.mxu0 %v1601_v38  ;;  %v2173_v37 = vld [vmem:[#allocation6 + $0x670] sm:$0xff]  ;;  %v2010_v38 = vld [vmem:[#allocation6 + $0x5f8] sm:$0xff] }
 0x28c   : > { %1886 = vmatmul.mubr.f32.vlgmr.msra.gmra.mxu1 %v1815_v40  ;;  %3249 = vmatprep.subr.mxu1 %v1994_v39  ;;  %v2188_v39 = vld [vmem:[#allocation6 + $0x6e8] sm:$0xff] }
 0x28d   : > { %3556 = vmatprep.subr.mxu0 %v4067_v0  ;;  %3250 = vmatpush3.msra.mxu1 %v1978_v41  ;;  %v2172_v40 = vld [vmem:[#allocation6 + $0x668] sm:$0xff]  ;;  %v2009_v41 = vld [vmem:[#allocation6 + $0x5f0] sm:$0xff] }
 0x28e   : > { %2081 = vmatprep.mubr.f32.mxu1 %v2012_v43  ;;  %3557 = vmatpush3.msra.mxu0 %v1600_v42  ;;  %v2187_v42 = vld [vmem:[#allocation6 + $0x6e0] sm:$0xff] }
 0x28f   : > { %3558 = vmatprep.mubr.msk.f32.mxu0 %vm4068_vm1, %v4067_v0  ;;  %3251 = vmatprep.subr.mxu1 %v1993_v44  ;;  %v2171_v43 = vld [vmem:[#allocation6 + $0x660] sm:$0xff]  ;;  %v2008_v44 = vld [vmem:[#allocation6 + $0x5e8] sm:$0xff] }
 0x290   : > { %3559 = vmatmul.mubr.f32.vlgmr.msra.gmra.mxu0 %v1621_v45  ;;  %3561 = vmatprep.subr.mxu0 %v4067_v0  ;;  %v2186_v45 = vld [vmem:[#allocation6 + $0x6d8] sm:$0xff] }
 0x291   : > { %3252 = vmatpush3.msra.mxu1 %v1977_v46  ;;  %3562 = vmatpush3.msra.mxu0 %v1814_v47  ;;  %v2170_v46 = vld [vmem:[#allocation6 + $0x658] sm:$0xff]  ;;  %v2007_v47 = vld [vmem:[#allocation6 + $0x5e0] sm:$0xff] }
 0x292   : > { %3253 = vmatprep.subr.mxu1 %v1992_v48  ;;  %3563 = vmatprep.subr.mxu0 %v4067_v0  ;;  %v2185_v48 = vld [vmem:[#allocation6 + $0x6d0] sm:$0xff] }
 0x293   : > { %3254 = vmatpush3.msra.mxu1 %v1976_v49  ;;  %3564 = vmatpush3.msra.mxu0 %v1813_v50  ;;  %v2169_v49 = vld [vmem:[#allocation6 + $0x650] sm:$0xff]  ;;  %v2006_v50 = vld [vmem:[#allocation6 + $0x5d8] sm:$0xff] }
 0x294   : > { %3255 = vmatprep.subr.mxu1 %v1991_v51  ;;  %3565 = vmatprep.subr.mxu0 %v4067_v0  ;;  %v2184_v51 = vld [vmem:[#allocation6 + $0x6c8] sm:$0xff] }
 0x295   : > { %3256 = vmatpush3.msra.mxu1 %v1975_v52  ;;  %3566 = vmatpush3.msra.mxu0 %v1812_v53  ;;  %v2168_v52 = vld [vmem:[#allocation6 + $0x648] sm:$0xff]  ;;  %v2005_v53 = vld [vmem:[#allocation6 + $0x5d0] sm:$0xff] }
 0x296   : > { %3257 = vmatprep.subr.mxu1 %v1990_v54  ;;  %3567 = vmatprep.subr.mxu0 %v4067_v0  ;;  %v2183_v54 = vld [vmem:[#allocation6 + $0x6c0] sm:$0xff] }
 0x297   : > { %3258 = vmatpush3.msra.mxu1 %v1974_v55  ;;  %3568 = vmatpush3.msra.mxu0 %v1811_v56  ;;  %v2167_v55 = vld [vmem:[#allocation6 + $0x640] sm:$0xff]  ;;  %v2004_v56 = vld [vmem:[#allocation6 + $0x5c8] sm:$0xff] }
 0x298   : > { %3259 = vmatprep.subr.mxu1 %v1989_v57  ;;  %3569 = vmatprep.subr.mxu0 %v4067_v0  ;;  %v2182_v57 = vld [vmem:[#allocation6 + $0x6b8] sm:$0xff] }
 0x299   : > { %3260 = vmatpush3.msra.mxu1 %v1973_v58  ;;  %3570 = vmatpush3.msra.mxu0 %v1810_v59  ;;  %v2166_v58 = vld [vmem:[#allocation6 + $0x638] sm:$0xff]  ;;  %v2003_v59 = vld [vmem:[#allocation6 + $0x5c0] sm:$0xff] }
 0x29a   : > { %3261 = vmatprep.subr.mxu1 %v1988_v61  ;;  %3571 = vmatprep.subr.mxu0 %v4067_v0  ;;  %v2181_v61 = vld [vmem:[#allocation6 + $0x6b0] sm:$0xff] }
 0x29b   : > { %3262 = vmatpush3.msra.mxu1 %v1972_v25  ;;  %3572 = vmatpush3.msra.mxu0 %v1809_v62  ;;  %v2165_v25 = vld [vmem:[#allocation6 + $0x630] sm:$0xff]  ;;  %v2002_v62 = vld [vmem:[#allocation6 + $0x5b8] sm:$0xff] }
 0x29c   : > { %3263 = vmatprep.subr.mxu1 %v1987_v12  ;;  %3573 = vmatprep.subr.mxu0 %v4067_v0  ;;  %v2180_v12 = vld [vmem:[#allocation6 + $0x6a8] sm:$0xff] }
 0x29d   : > { %3264 = vmatpush3.msra.mxu1 %v1971_v11  ;;  %3574 = vmatpush3.msra.mxu0 %v1808_v14  ;;  %v2164_v11 = vld [vmem:[#allocation6 + $0x628] sm:$0xff]  ;;  %v2001_v14 = vld [vmem:[#allocation6 + $0x5b0] sm:$0xff] }
 0x29e   : > { %3265 = vmatprep.subr.mxu1 %v1986_v2  ;;  %3575 = vmatprep.subr.mxu0 %v4067_v0  ;;  %v2179_v2 = vld [vmem:[#allocation6 + $0x6a0] sm:$0xff] }
 0x29f   : > { %3266 = vmatpush3.msra.mxu1 %v1970_v3  ;;  %3576 = vmatpush3.msra.mxu0 %v1807_v4  ;;  %v2163_v3 = vld [vmem:[#allocation6 + $0x620] sm:$0xff]  ;;  %v2000_v4 = vld [vmem:[#allocation6 + $0x5a8] sm:$0xff] }
 0x2a0   : > { %3267 = vmatprep.subr.mxu1 %v1985_v5  ;;  %3577 = vmatprep.subr.mxu0 %v4067_v0  ;;  %v2178_v5 = vld [vmem:[#allocation6 + $0x698] sm:$0xff] }
 0x2a1   : > { %3268 = vmatpush3.msra.mxu1 %v1969_v6  ;;  %3578 = vmatpush3.msra.mxu0 %v1806_v7  ;;  %v2162_v6 = vld [vmem:[#allocation6 + $0x618] sm:$0xff]  ;;  %v1999_v7 = vld [vmem:[#allocation6 + $0x5a0] sm:$0xff] }
 0x2a2   : > { %3269 = vmatprep.subr.mxu1 %v1984_v8  ;;  %3579 = vmatprep.subr.mxu0 %v4067_v0  ;;  %v2177_v8 = vld [vmem:[#allocation6 + $0x690] sm:$0xff] }
 0x2a3   : > { %3270 = vmatpush3.msra.mxu1 %v1968_v9  ;;  %3580 = vmatpush3.msra.mxu0 %v1805_v10  ;;  %v2161_v9 = vld [vmem:[#allocation6 + $0x610] sm:$0xff]  ;;  %v1998_v10 = vld [vmem:[#allocation6 + $0x598] sm:$0xff] }
 0x2a4   : > { %3271 = vmatprep.subr.mxu1 %v1983_v13  ;;  %3581 = vmatprep.subr.mxu0 %v4067_v0  ;;  %v2176_v13 = vld [vmem:[#allocation6 + $0x688] sm:$0xff] }
 0x2a5   : > { %3272 = vmatpush3.msra.mxu1 %v1967_v15  ;;  %3582 = vmatpush3.msra.mxu0 %v1804_v16  ;;  %v2160_v15 = vld [vmem:[#allocation6 + $0x608] sm:$0xff]  ;;  %v1997_v16 = vld [vmem:[#allocation6 + $0x590] sm:$0xff] }
 0x2a6   : > { %3273 = vmatprep.subr.mxu1 %v1982_v17  ;;  %3583 = vmatprep.subr.mxu0 %v4067_v0  ;;  %v2175_v17 = vld [vmem:[#allocation6 + $0x680] sm:$0xff] }
 0x2a7   : > { %3274 = vmatpush3.msra.mxu1 %v1966_v18  ;;  %3584 = vmatpush3.msra.mxu0 %v1803_v19  ;;  %v2159_v18 = vld [vmem:[#allocation6 + $0x600] sm:$0xff]  ;;  %v1996_v19 = vld [vmem:[#allocation6 + $0x588] sm:$0xff] }
 0x2a8   : > { %3275 = vmatprep.subr.mxu1 %v1981_v20  ;;  %3585 = vmatprep.subr.mxu0 %v4067_v0  ;;  %v2386_v20 = vld [vmem:[#allocation6 + $0x878] sm:$0xff] }
 0x2a9   : > { %3276 = vmatpush3.msra.mxu1 %v1965_v21  ;;  %3586 = vmatpush3.msra.mxu0 %v1802_v22  ;;  %v2207_v21 = vrot.slane %v5024_v1, 4  ;;  %v2370_v22 = vld [vmem:[#allocation6 + $0x7f8] sm:$0xff] }
 0x2aa   : > { %3277 = vmatprep.subr.mxu1 %v1980_v23  ;;  %3587 = vmatprep.subr.mxu0 %v4067_v0  ;;  %v1995_v23 = vld [vmem:[#allocation6 + $0x580] sm:$0xff] }
 0x2ab   : > { %3278 = vmatpush3.msra.mxu1 %v1964_v24  ;;  %3588 = vmatpush3.msra.mxu0 %v1801_v26  ;;  %v2404_v24 = vrot.slane %v5021_v63, 5  ;;  %v2385_v26 = vld [vmem:[#allocation6 + $0x870] sm:$0xff] }
 0x2ac   : > { %3279 = vmatprep.subr.mxu1 %v1979_v27  ;;  %3589 = vmatprep.subr.mxu0 %v4067_v0  ;;  %v2013_v27 = vrot.slane %v5019_v60, 3  ;;  %v2205_v63 = vld [vmem:[#allocation6 + $0x770] sm:$0xff] }
 0x2ad   : > { %3280 = vmatpush3.msra.mxu1 %v1963_v28  ;;  %3590 = vmatpush3.msra.mxu0 %v1800_v29  ;;  %v2369_v28 = vld [vmem:[#allocation6 + $0x7f0] sm:$0xff]  ;;  %v2206_v29 = vld [vmem:[#allocation6 + $0x778] sm:$0xff] }
 0x2ae   : > { %2082 = vmatmul.mubr.f32.vlgmr.msra.gmra.mxu1 %v2011_v31  ;;  %3301 = vmatprep.subr.mxu1 %v2190_v30  ;;  %v2384_v30 = vld [vmem:[#allocation6 + $0x868] sm:$0xff] }
 0x2af   : > { %3591 = vmatprep.subr.mxu0 %v4067_v0  ;;  %3302 = vmatpush3.msra.mxu1 %v2174_v32  ;;  %v2368_v31 = vld [vmem:[#allocation6 + $0x7e8] sm:$0xff]  ;;  %v2383_v32 = vld [vmem:[#allocation6 + $0x860] sm:$0xff] }
 0x2b0   : > { %2277 = vmatprep.mubr.f32.mxu1 %v2208_v34  ;;  %3592 = vmatpush3.msra.mxu0 %v1799_v33  ;;  %v2367_v33 = vld [vmem:[#allocation6 + $0x7e0] sm:$0xff]  ;;  %v2204_v34 = vld [vmem:[#allocation6 + $0x768] sm:$0xff] }
 0x2b1   : > { %3593 = vmatprep.mubr.msk.f32.mxu0 %vm4068_vm1, %v4067_v0  ;;  %3303 = vmatprep.subr.mxu1 %v2189_v35  ;;  %v2382_v35 = vld [vmem:[#allocation6 + $0x858] sm:$0xff] }
 0x2b2   : > { %3594 = vmatmul.mubr.f32.vlgmr.msra.gmra.mxu0 %v1817_v36  ;;  %3596 = vmatprep.subr.mxu0 %v4067_v0  ;;  %v2366_v36 = vld [vmem:[#allocation6 + $0x7d8] sm:$0xff] }
 0x2b3   : > { %3304 = vmatpush3.msra.mxu1 %v2173_v37  ;;  %3597 = vmatpush3.msra.mxu0 %v2010_v38  ;;  %v2203_v37 = vld [vmem:[#allocation6 + $0x760] sm:$0xff]  ;;  %v2381_v38 = vld [vmem:[#allocation6 + $0x850] sm:$0xff] }
 0x2b4   : > { %3305 = vmatprep.subr.mxu1 %v2188_v39  ;;  %3598 = vmatprep.subr.mxu0 %v4067_v0  ;;  %v2365_v39 = vld [vmem:[#allocation6 + $0x7d0] sm:$0xff] }
 0x2b5   : > { %3306 = vmatpush3.msra.mxu1 %v2172_v40  ;;  %3599 = vmatpush3.msra.mxu0 %v2009_v41  ;;  %v2202_v40 = vld [vmem:[#allocation6 + $0x758] sm:$0xff]  ;;  %v2380_v41 = vld [vmem:[#allocation6 + $0x848] sm:$0xff] }
 0x2b6   : > { %3307 = vmatprep.subr.mxu1 %v2187_v42  ;;  %3600 = vmatprep.subr.mxu0 %v4067_v0  ;;  %v2364_v42 = vld [vmem:[#allocation6 + $0x7c8] sm:$0xff] }
 0x2b7   : > { %3308 = vmatpush3.msra.mxu1 %v2171_v43  ;;  %3601 = vmatpush3.msra.mxu0 %v2008_v44  ;;  %v2201_v43 = vld [vmem:[#allocation6 + $0x750] sm:$0xff]  ;;  %v2379_v44 = vld [vmem:[#allocation6 + $0x840] sm:$0xff] }
 0x2b8   : > { %3309 = vmatprep.subr.mxu1 %v2186_v45  ;;  %3602 = vmatprep.subr.mxu0 %v4067_v0  ;;  %v2363_v45 = vld [vmem:[#allocation6 + $0x7c0] sm:$0xff] }
 0x2b9   : > { %3310 = vmatpush3.msra.mxu1 %v2170_v46  ;;  %3603 = vmatpush3.msra.mxu0 %v2007_v47  ;;  %v2200_v46 = vld [vmem:[#allocation6 + $0x748] sm:$0xff]  ;;  %v2378_v47 = vld [vmem:[#allocation6 + $0x838] sm:$0xff] }
 0x2ba   : > { %3311 = vmatprep.subr.mxu1 %v2185_v48  ;;  %3604 = vmatprep.subr.mxu0 %v4067_v0  ;;  %v2362_v48 = vld [vmem:[#allocation6 + $0x7b8] sm:$0xff] }
 0x2bb   : > { %3312 = vmatpush3.msra.mxu1 %v2169_v49  ;;  %3605 = vmatpush3.msra.mxu0 %v2006_v50  ;;  %v2199_v49 = vld [vmem:[#allocation6 + $0x740] sm:$0xff]  ;;  %v2377_v50 = vld [vmem:[#allocation6 + $0x830] sm:$0xff] }
 0x2bc   : > { %3313 = vmatprep.subr.mxu1 %v2184_v51  ;;  %3606 = vmatprep.subr.mxu0 %v4067_v0  ;;  %v2361_v51 = vld [vmem:[#allocation6 + $0x7b0] sm:$0xff] }
 0x2bd   : > { %3314 = vmatpush3.msra.mxu1 %v2168_v52  ;;  %3607 = vmatpush3.msra.mxu0 %v2005_v53  ;;  %v2198_v52 = vld [vmem:[#allocation6 + $0x738] sm:$0xff]  ;;  %v2376_v53 = vld [vmem:[#allocation6 + $0x828] sm:$0xff] }
 0x2be   : > { %3315 = vmatprep.subr.mxu1 %v2183_v54  ;;  %3608 = vmatprep.subr.mxu0 %v4067_v0  ;;  %v2360_v54 = vld [vmem:[#allocation6 + $0x7a8] sm:$0xff] }
 0x2bf   : > { %3316 = vmatpush3.msra.mxu1 %v2167_v55  ;;  %3609 = vmatpush3.msra.mxu0 %v2004_v56  ;;  %v2197_v55 = vld [vmem:[#allocation6 + $0x730] sm:$0xff]  ;;  %v2375_v56 = vld [vmem:[#allocation6 + $0x820] sm:$0xff] }
 0x2c0   : > { %3317 = vmatprep.subr.mxu1 %v2182_v57  ;;  %3610 = vmatprep.subr.mxu0 %v4067_v0  ;;  %v2359_v57 = vld [vmem:[#allocation6 + $0x7a0] sm:$0xff] }
 0x2c1   : > { %3318 = vmatpush3.msra.mxu1 %v2166_v58  ;;  %3611 = vmatpush3.msra.mxu0 %v2003_v59  ;;  %v2196_v58 = vld [vmem:[#allocation6 + $0x728] sm:$0xff]  ;;  %v2374_v59 = vld [vmem:[#allocation6 + $0x818] sm:$0xff] }
 0x2c2   : > { %3319 = vmatprep.subr.mxu1 %v2181_v61  ;;  %3612 = vmatprep.subr.mxu0 %v4067_v0  ;;  %v2358_v61 = vld [vmem:[#allocation6 + $0x798] sm:$0xff] }
 0x2c3   : > { %3320 = vmatpush3.msra.mxu1 %v2165_v25  ;;  %3613 = vmatpush3.msra.mxu0 %v2002_v62  ;;  %v2195_v25 = vld [vmem:[#allocation6 + $0x720] sm:$0xff]  ;;  %v2373_v62 = vld [vmem:[#allocation6 + $0x810] sm:$0xff] }
 0x2c4   : > { %3321 = vmatprep.subr.mxu1 %v2180_v12  ;;  %3614 = vmatprep.subr.mxu0 %v4067_v0  ;;  %v2357_v12 = vld [vmem:[#allocation6 + $0x790] sm:$0xff] }
 0x2c5   : > { %3322 = vmatpush3.msra.mxu1 %v2164_v11  ;;  %3615 = vmatpush3.msra.mxu0 %v2001_v14  ;;  %v2194_v11 = vld [vmem:[#allocation6 + $0x718] sm:$0xff]  ;;  %v2372_v14 = vld [vmem:[#allocation6 + $0x808] sm:$0xff] }
 0x2c6   : > { %3323 = vmatprep.subr.mxu1 %v2179_v2  ;;  %3616 = vmatprep.subr.mxu0 %v4067_v0  ;;  %v2356_v2 = vld [vmem:[#allocation6 + $0x788] sm:$0xff] }
 0x2c7   : > { %3324 = vmatpush3.msra.mxu1 %v2163_v3  ;;  %3617 = vmatpush3.msra.mxu0 %v2000_v4  ;;  %v2193_v3 = vld [vmem:[#allocation6 + $0x710] sm:$0xff]  ;;  %v2371_v4 = vld [vmem:[#allocation6 + $0x800] sm:$0xff] }
 0x2c8   : > { %3325 = vmatprep.subr.mxu1 %v2178_v5  ;;  %3618 = vmatprep.subr.mxu0 %v4067_v0  ;;  %v2355_v5 = vld [vmem:[#allocation6 + $0x780] sm:$0xff] }
 0x2c9   : > { %3326 = vmatpush3.msra.mxu1 %v2162_v6  ;;  %3619 = vmatpush3.msra.mxu0 %v1999_v7  ;;  %v2192_v6 = vld [vmem:[#allocation6 + $0x708] sm:$0xff]  ;;  %v2403_v7 = vrot.slane %v5024_v1, 5 }
 0x2ca   : > { %3327 = vmatprep.subr.mxu1 %v2177_v8  ;;  %3620 = vmatprep.subr.mxu0 %v4067_v0  ;;  %v2191_v8 = vld [vmem:[#allocation6 + $0x700] sm:$0xff]  ;;  %v2400_v1 = vld [vmem:[#allocation6 + $0x8e8] sm:$0xff] }
 0x2cb   : > { %3328 = vmatpush3.msra.mxu1 %v2161_v9  ;;  %3621 = vmatpush3.msra.mxu0 %v1998_v10  ;;  %v2209_v9 = vrot.slane %v5019_v60, 4  ;;  %v2402_v10 = vld [vmem:[#allocation6 + $0x8f8] sm:$0xff] }
 0x2cc   : > { %3329 = vmatprep.subr.mxu1 %v2176_v13  ;;  %3622 = vmatprep.subr.mxu0 %v4067_v0  ;;  %v2401_v13 = vld [vmem:[#allocation6 + $0x8f0] sm:$0xff] }
 0x2cd   : > { %3330 = vmatpush3.msra.mxu1 %v2160_v15  ;;  %3623 = vmatpush3.msra.mxu0 %v1997_v16  ;;  %v2399_v15 = vld [vmem:[#allocation6 + $0x8e0] sm:$0xff]  ;;  %v2398_v16 = vld [vmem:[#allocation6 + $0x8d8] sm:$0xff] }
 0x2ce   : > { %3331 = vmatprep.subr.mxu1 %v2175_v17  ;;  %3624 = vmatprep.subr.mxu0 %v4067_v0  ;;  %v2397_v17 = vld [vmem:[#allocation6 + $0x8d0] sm:$0xff] }
 0x2cf   : > { %3332 = vmatpush3.msra.mxu1 %v2159_v18  ;;  %3625 = vmatpush3.msra.mxu0 %v1996_v19  ;;  %v2396_v18 = vld [vmem:[#allocation6 + $0x8c8] sm:$0xff]  ;;  %v2395_v19 = vld [vmem:[#allocation6 + $0x8c0] sm:$0xff] }
 0x2d0   : > { %2278 = vmatmul.mubr.f32.vlgmr.msra.gmra.mxu1 %v2207_v21  ;;  %3353 = vmatprep.subr.mxu1 %v2386_v20  ;;  %v2394_v20 = vld [vmem:[#allocation6 + $0x8b8] sm:$0xff]  ;;  %v2393_v21 = vld [vmem:[#allocation6 + $0x8b0] sm:$0xff] }
 0x2d1   : > { %3626 = vmatprep.subr.mxu0 %v4067_v0  ;;  %3354 = vmatpush3.msra.mxu1 %v2370_v22  ;;  %v2392_v22 = vld [vmem:[#allocation6 + $0x8a8] sm:$0xff] }
 0x2d2   : > { %2473 = vmatprep.mubr.f32.mxu1 %v2404_v24  ;;  %3627 = vmatpush3.msra.mxu0 %v1995_v23  ;;  %v2391_v23 = vld [vmem:[#allocation6 + $0x8a0] sm:$0xff] }
 0x2d3   : > { %3628 = vmatprep.mubr.msk.f32.mxu0 %vm4068_vm1, %v4067_v0  ;;  %3355 = vmatprep.subr.mxu1 %v2385_v26  ;;  %v2390_v26 = vld [vmem:[#allocation6 + $0x898] sm:$0xff] }
 0x2d4   : > { %3629 = vmatmul.mubr.f32.vlgmr.msra.gmra.mxu0 %v2013_v27  ;;  %3631 = vmatprep.subr.mxu0 %v4067_v0 }
 0x2d5   : > { %3356 = vmatpush3.msra.mxu1 %v2369_v28  ;;  %3632 = vmatpush3.msra.mxu0 %v2206_v29  ;;  %v2389_v28 = vld [vmem:[#allocation6 + $0x890] sm:$0xff] }
 0x2d6   : > { %3357 = vmatprep.subr.mxu1 %v2384_v30  ;;  %3633 = vmatprep.subr.mxu0 %v4067_v0  ;;  %v2388_v30 = vld [vmem:[#allocation6 + $0x888] sm:$0xff] }
 0x2d7   : > { %3358 = vmatpush3.msra.mxu1 %v2368_v31  ;;  %3634 = vmatpush3.msra.mxu0 %v2205_v63 }
 0x2d8   : > { %3359 = vmatprep.subr.mxu1 %v2383_v32  ;;  %3635 = vmatprep.subr.mxu0 %v4067_v0  ;;  %v2387_v32 = vld [vmem:[#allocation6 + $0x880] sm:$0xff] }
 0x2d9   : > { %3360 = vmatpush3.msra.mxu1 %v2367_v33  ;;  %3636 = vmatpush3.msra.mxu0 %v2204_v34  ;;  %v2405_v34 = vrot.slane %v5019_v60, 5  ;;  %v2568_v60 = vld [vmem:[%s5427_s10 + $0x78] sm:$0xff] }
 0x2da   : > { %3361 = vmatprep.subr.mxu1 %v2382_v35  ;;  %3637 = vmatprep.subr.mxu0 %v4067_v0 }
 0x2db   : > { %3362 = vmatpush3.msra.mxu1 %v2366_v36  ;;  %3638 = vmatpush3.msra.mxu0 %v2203_v37 }
 0x2dc   : > { %3363 = vmatprep.subr.mxu1 %v2381_v38  ;;  %3639 = vmatprep.subr.mxu0 %v4067_v0  ;;  %v2585_v38 = vld [vmem:[%s5428_s11 + $0x78] sm:$0xff] }
 0x2dd   : > { %3364 = vmatpush3.msra.mxu1 %v2365_v39  ;;  %3640 = vmatpush3.msra.mxu0 %v2202_v40  ;;  %v2584_v39 = vld [vmem:[%s5428_s11 + $0x70] sm:$0xff] }
 0x2de   : > { %3365 = vmatprep.subr.mxu1 %v2380_v41  ;;  %3641 = vmatprep.subr.mxu0 %v4067_v0  ;;  %v2567_v40 = vld [vmem:[%s5427_s10 + $0x70] sm:$0xff]  ;;  %v2583_v41 = vld [vmem:[%s5428_s11 + $0x68] sm:$0xff] }
 0x2df   : > { %3366 = vmatpush3.msra.mxu1 %v2364_v42  ;;  %3642 = vmatpush3.msra.mxu0 %v2201_v43  ;;  %v2566_v42 = vld [vmem:[%s5427_s10 + $0x68] sm:$0xff]  ;;  %v2582_v43 = vld [vmem:[%s5428_s11 + $0x60] sm:$0xff] }
 0x2e0   : > { %3367 = vmatprep.subr.mxu1 %v2379_v44  ;;  %3643 = vmatprep.subr.mxu0 %v4067_v0  ;;  %v2565_v44 = vld [vmem:[%s5427_s10 + $0x60] sm:$0xff] }
 0x2e1   : > { %3368 = vmatpush3.msra.mxu1 %v2363_v45  ;;  %3644 = vmatpush3.msra.mxu0 %v2200_v46  ;;  %v2581_v45 = vld [vmem:[%s5428_s11 + $0x58] sm:$0xff] }
 0x2e2   : > { %3369 = vmatprep.subr.mxu1 %v2378_v47  ;;  %3645 = vmatprep.subr.mxu0 %v4067_v0  ;;  %v2564_v46 = vld [vmem:[%s5427_s10 + $0x58] sm:$0xff]  ;;  %v2580_v47 = vld [vmem:[%s5428_s11 + $0x50] sm:$0xff] }
 0x2e3   : > { %3370 = vmatpush3.msra.mxu1 %v2362_v48  ;;  %3646 = vmatpush3.msra.mxu0 %v2199_v49  ;;  %v2563_v48 = vld [vmem:[%s5427_s10 + $0x50] sm:$0xff]  ;;  %v2579_v49 = vld [vmem:[%s5428_s11 + $0x48] sm:$0xff] }
 0x2e4   : > { %3371 = vmatprep.subr.mxu1 %v2377_v50  ;;  %3647 = vmatprep.subr.mxu0 %v4067_v0  ;;  %v2562_v50 = vld [vmem:[%s5427_s10 + $0x48] sm:$0xff] }
 0x2e5   : > { %3372 = vmatpush3.msra.mxu1 %v2361_v51  ;;  %3648 = vmatpush3.msra.mxu0 %v2198_v52  ;;  %v2578_v51 = vld [vmem:[%s5428_s11 + $0x40] sm:$0xff] }
 0x2e6   : > { %3373 = vmatprep.subr.mxu1 %v2376_v53  ;;  %3649 = vmatprep.subr.mxu0 %v4067_v0  ;;  %v2561_v52 = vld [vmem:[%s5427_s10 + $0x40] sm:$0xff]  ;;  %v2577_v53 = vld [vmem:[%s5428_s11 + $0x38] sm:$0xff] }
 0x2e7   : > { %3374 = vmatpush3.msra.mxu1 %v2360_v54  ;;  %3650 = vmatpush3.msra.mxu0 %v2197_v55  ;;  %v2560_v54 = vld [vmem:[%s5427_s10 + $0x38] sm:$0xff]  ;;  %v2576_v55 = vld [vmem:[%s5428_s11 + $0x30] sm:$0xff] }
 0x2e8   : > { %3375 = vmatprep.subr.mxu1 %v2375_v56  ;;  %3651 = vmatprep.subr.mxu0 %v4067_v0  ;;  %v2559_v56 = vld [vmem:[%s5427_s10 + $0x30] sm:$0xff] }
 0x2e9   : > { %3376 = vmatpush3.msra.mxu1 %v2359_v57  ;;  %3652 = vmatpush3.msra.mxu0 %v2196_v58  ;;  %v2575_v58 = vld [vmem:[%s5428_s11 + $0x28] sm:$0xff] }
 0x2ea   : > { %3377 = vmatprep.subr.mxu1 %v2374_v59  ;;  %3653 = vmatprep.subr.mxu0 %v4067_v0  ;;  %v2558_v59 = vld [vmem:[%s5427_s10 + $0x28] sm:$0xff] }
 0x2eb   : > { %3378 = vmatpush3.msra.mxu1 %v2358_v61  ;;  %3654 = vmatpush3.msra.mxu0 %v2195_v25  ;;  %v2574_v61 = vld [vmem:[%s5428_s11 + $0x20] sm:$0xff] }
 0x2ec   : > { %3379 = vmatprep.subr.mxu1 %v2373_v62  ;;  %3655 = vmatprep.subr.mxu0 %v4067_v0 }
 0x2ed   : > { %3380 = vmatpush3.msra.mxu1 %v2357_v12  ;;  %3656 = vmatpush3.msra.mxu0 %v2194_v11 }
 0x2ee   : > { %3381 = vmatprep.subr.mxu1 %v2372_v14  ;;  %3657 = vmatprep.subr.mxu0 %v4067_v0 }
 0x2ef   : > { %3382 = vmatpush3.msra.mxu1 %v2356_v2  ;;  %3658 = vmatpush3.msra.mxu0 %v2193_v3  ;;  %v2573_v3 = vld [vmem:[%s5428_s11 + $0x18] sm:$0xff] }
 0x2f0   : > { %3383 = vmatprep.subr.mxu1 %v2371_v4  ;;  %3659 = vmatprep.subr.mxu0 %v4067_v0  ;;  %v2557_v4 = vld [vmem:[%s5427_s10 + $0x20] sm:$0xff] }
 0x2f1   : > { %3384 = vmatpush3.msra.mxu1 %v2355_v5  ;;  %3660 = vmatpush3.msra.mxu0 %v2192_v6  ;;  %v2572_v5 = vld [vmem:[%s5428_s11 + $0x10] sm:$0xff]  ;;  %v2556_v6 = vld [vmem:[%s5427_s10 + $0x18] sm:$0xff] }
 0x2f2   : > { %2474 = vmatmul.mubr.f32.vlgmr.msra.gmra.mxu1 %v2403_v7  ;;  %3661 = vmatprep.subr.mxu0 %v4067_v0  ;;  %v2571_v7 = vld [vmem:[%s5428_s11 + $0x8] sm:$0xff] }
 0x2f3   : > { %3662 = vmatpush3.msra.mxu0 %v2191_v8  ;;  %3663 = vmatprep.mubr.msk.f32.mxu0 %vm4068_vm1, %v4067_v0  ;;  %v2555_v8 = vld [vmem:[%s5427_s10 + $0x10] sm:$0xff] }
 0x2f4   : > { %3664 = vmatmul.mubr.f32.vlgmr.msra.gmra.mxu0 %v2209_v9  ;;  %3666 = vmatprep.subr.mxu0 %v4067_v0  ;;  %v2570_v9 = vld [vmem:[%s5428_s11] sm:$0xff] }
 0x2f5   : > { %3667 = vmatpush3.msra.mxu0 %v2402_v10  ;;  %3698 = vmatprep.mubr.msk.f32.mxu0 %vm4068_vm1, %v4067_v0  ;;  %v2554_v10 = vld [vmem:[%s5427_s10 + $0x8] sm:$0xff] }
 0x2f6   : > { %3668 = vmatprep.subr.mxu0 %v4067_v0  ;;  %3701 = vmatprep.subr.mxu1 %v4067_v0 }
 0x2f7   : > { %3669 = vmatpush3.msra.mxu0 %v2401_v13  ;;  %3733 = vmatprep.mubr.msk.f32.mxu1 %vm4068_vm1, %v4067_v0  ;;  %v2569_v13 = vld [vmem:[%s590_s26] sm:$0x1] }
 0x2f8   : > { %3670 = vmatprep.subr.mxu0 %v4067_v0  ;;  %3702 = vmatpush3.msra.mxu1 %v2585_v38 }
 0x2f9   : > { %3671 = vmatpush3.msra.mxu0 %v2400_v1  ;;  %3703 = vmatprep.subr.mxu1 %v4067_v0  ;;  %v2553_v1 = vld [vmem:[%s5427_s10] sm:$0xff] }
 0x2fa   : > { %3672 = vmatprep.subr.mxu0 %v4067_v0  ;;  %3704 = vmatpush3.msra.mxu1 %v2584_v39 }
 0x2fb   : > { %3673 = vmatpush3.msra.mxu0 %v2399_v15  ;;  %3705 = vmatprep.subr.mxu1 %v4067_v0  ;;  %v2744_v15 = vld [vmem:[%s5430_s13 + $0x78] sm:$0xff] }
 0x2fc   : > { %3674 = vmatprep.subr.mxu0 %v4067_v0  ;;  %3706 = vmatpush3.msra.mxu1 %v2583_v41 }
 0x2fd   : > { %3675 = vmatpush3.msra.mxu0 %v2398_v16  ;;  %3707 = vmatprep.subr.mxu1 %v4067_v0  ;;  %v2743_v16 = vld [vmem:[%s5430_s13 + $0x70] sm:$0xff] }
 0x2fe   : > { %3676 = vmatprep.subr.mxu0 %v4067_v0  ;;  %3708 = vmatpush3.msra.mxu1 %v2582_v43 }
 0x2ff   : > { %3677 = vmatpush3.msra.mxu0 %v2397_v17  ;;  %3709 = vmatprep.subr.mxu1 %v4067_v0  ;;  %v2742_v17 = vld [vmem:[%s5430_s13 + $0x68] sm:$0xff] }
 0x300   : > { %3678 = vmatprep.subr.mxu0 %v4067_v0  ;;  %3710 = vmatpush3.msra.mxu1 %v2581_v45 }
 0x301   : > { %3679 = vmatpush3.msra.mxu0 %v2396_v18  ;;  %3711 = vmatprep.subr.mxu1 %v4067_v0  ;;  %v2741_v18 = vld [vmem:[%s5430_s13 + $0x60] sm:$0xff] }
 0x302   : > { %3680 = vmatprep.subr.mxu0 %v4067_v0  ;;  %3712 = vmatpush3.msra.mxu1 %v2580_v47 }
 0x303   : > { %3681 = vmatpush3.msra.mxu0 %v2395_v19  ;;  %3713 = vmatprep.subr.mxu1 %v4067_v0  ;;  %v2740_v19 = vld [vmem:[%s5430_s13 + $0x58] sm:$0xff] }
 0x304   : > { %3682 = vmatprep.subr.mxu0 %v4067_v0  ;;  %3714 = vmatpush3.msra.mxu1 %v2579_v49 }
 0x305   : > { %3683 = vmatpush3.msra.mxu0 %v2394_v20  ;;  %3715 = vmatprep.subr.mxu1 %v4067_v0  ;;  %v2739_v20 = vld [vmem:[%s5430_s13 + $0x50] sm:$0xff] }
 0x306   : > { %3684 = vmatprep.subr.mxu0 %v4067_v0  ;;  %3716 = vmatpush3.msra.mxu1 %v2578_v51 }
 0x307   : > { %3685 = vmatpush3.msra.mxu0 %v2393_v21  ;;  %3717 = vmatprep.subr.mxu1 %v4067_v0  ;;  %v2738_v21 = vld [vmem:[%s5430_s13 + $0x48] sm:$0xff] }
 0x308   : > { %3686 = vmatprep.subr.mxu0 %v4067_v0  ;;  %3718 = vmatpush3.msra.mxu1 %v2577_v53 }
 0x309   : > { %3687 = vmatpush3.msra.mxu0 %v2392_v22  ;;  %v1493_v24 = vpop.f32.mrf.mxu1  ;;  %3719 = vmatprep.subr.mxu1 %v4067_v0  ;;  %v2737_v22 = vld [vmem:[%s5430_s13 + $0x40] sm:$0xff] }
 0x30a   : > { %3688 = vmatprep.subr.mxu0 %v4067_v0  ;;  %3720 = vmatpush3.msra.mxu1 %v2576_v55 }
 0x30b   : > { %3689 = vmatpush3.msra.mxu0 %v2391_v23  ;;  %v3490_v27 = vpop.f32.mrf.mxu1  ;;  %3721 = vmatprep.subr.mxu1 %v4067_v0 }
 0x30c   : > { %3690 = vmatprep.subr.mxu0 %v4067_v0  ;;  %v3108_v29 = vpop.f32.mrf.mxu0  ;;  %3722 = vmatpush3.msra.mxu1 %v2575_v58  ;;  %v2732_v58 = vld [vmem:[%s5430_s13 + $0x18] sm:$0xff] }
 0x30d   : > { %3691 = vmatpush3.msra.mxu0 %v2390_v26  ;;  %3723 = vmatprep.subr.mxu1 %v4067_v0  ;;  %v2735_v26 = vld [vmem:[%s5430_s13 + $0x30] sm:$0xff] }
 0x30e   : > { %3692 = vmatprep.subr.mxu0 %v4067_v0  ;;  %v3109_v31 = vpop.f32.mrf.mxu0  ;;  %3724 = vmatpush3.msra.mxu1 %v2574_v61  ;;  %v2731_v61 = vld [vmem:[%s5430_s13 + $0x10] sm:$0xff] }
 0x30f   : > { %3693 = vmatpush3.msra.mxu0 %v2389_v28  ;;  %v3110_v63 = vadd.f32 %v3109_v31, %v3108_v29  ;;  %3725 = vmatprep.subr.mxu1 %v4067_v0  ;;  %v2734_v28 = vld [vmem:[%s5430_s13 + $0x28] sm:$0xff] }
 0x310   : > { %3694 = vmatprep.subr.mxu0 %v4067_v0  ;;  %3726 = vmatpush3.msra.mxu1 %v2573_v3 }
 0x311   : > { %3695 = vmatpush3.msra.mxu0 %v2388_v30  ;;  %v1494_v33 = vadd.f32 %v3110_v63, %v1493_v24  ;;  %3727 = vmatprep.subr.mxu1 %v4067_v0  ;;  %v2736_v24 = vld [vmem:[%s5430_s13 + $0x38] sm:$0xff] }
 0x312   : > { %3696 = vmatprep.subr.mxu0 %v4067_v0  ;;  %3728 = vmatpush3.msra.mxu1 %v2572_v5  ;;  %v2745_v5 = vld [vmem:[#allocation10] sm:$0x1] }
 0x313   : > { %3697 = vmatpush3.msra.mxu0 %v2387_v32  ;;  %3729 = vmatprep.subr.mxu1 %v4067_v0 }
 0x314   : > { %3699 = vmatmul.mubr.f32.vlgmr.msra.gmra.mxu0 %v2405_v34  ;;  %3736 = vmatprep.subr.mxu0 %v4067_v0 }
 0x315   : > { %3768 = vmatprep.mubr.msk.f32.mxu0 %vm4068_vm1, %v4067_v0  ;;  %3737 = vmatpush3.msra.mxu0 %v2568_v60 }
 0x316   : > { %3738 = vmatprep.subr.mxu0 %v4067_v0  ;;  %3730 = vmatpush3.msra.mxu1 %v2571_v7 }
 0x317   : > { %3739 = vmatpush3.msra.mxu0 %v2567_v40  ;;  %3731 = vmatprep.subr.mxu1 %v4067_v0 }
 0x318   : > { %3740 = vmatprep.subr.mxu0 %v4067_v0  ;;  %3732 = vmatpush3.msra.mxu1 %v2570_v9 }
 0x319   : > { %3741 = vmatpush3.msra.mxu0 %v2566_v42  ;;  %3734 = vmatmul.mubr.f32.vlgmr.msra.gmra.mxu1 %v2569_v13 }
 0x31a   : > { %3742 = vmatprep.subr.mxu0 %v4067_v0  ;;  %3771 = vmatprep.subr.mxu1 %v4067_v0 }
 0x31b   : > { %3743 = vmatpush3.msra.mxu0 %v2565_v44  ;;  %3772 = vmatpush3.msra.mxu1 %v2744_v15 }
 0x31c   : > { %3744 = vmatprep.subr.mxu0 %v4067_v0  ;;  %3803 = vmatprep.mubr.msk.f32.mxu1 %vm4068_vm1, %v4067_v0 }
 0x31d   : > { %3745 = vmatpush3.msra.mxu0 %v2564_v46  ;;  %3773 = vmatprep.subr.mxu1 %v4067_v0 }
 0x31e   : > { %3746 = vmatprep.subr.mxu0 %v4067_v0  ;;  %3774 = vmatpush3.msra.mxu1 %v2743_v16 }
 0x31f   : > { %3747 = vmatpush3.msra.mxu0 %v2563_v48  ;;  %3775 = vmatprep.subr.mxu1 %v4067_v0 }
 0x320   : > { %3748 = vmatprep.subr.mxu0 %v4067_v0  ;;  %3776 = vmatpush3.msra.mxu1 %v2742_v17 }
 0x321   : > { %3749 = vmatpush3.msra.mxu0 %v2562_v50  ;;  %3777 = vmatprep.subr.mxu1 %v4067_v0 }
 0x322   : > { %3750 = vmatprep.subr.mxu0 %v4067_v0  ;;  %3778 = vmatpush3.msra.mxu1 %v2741_v18 }
 0x323   : > { %3751 = vmatpush3.msra.mxu0 %v2561_v52  ;;  %3779 = vmatprep.subr.mxu1 %v4067_v0  ;;  %v2550_v52 = vld [vmem:[#allocation7] sm:$0x1] }
 0x324   : > { %3752 = vmatprep.subr.mxu0 %v4067_v0  ;;  %3780 = vmatpush3.msra.mxu1 %v2740_v19 }
 0x325   : > { %3753 = vmatpush3.msra.mxu0 %v2560_v54  ;;  %3781 = vmatprep.subr.mxu1 %v4067_v0 }
 0x326   : > { %3754 = vmatprep.subr.mxu0 %v4067_v0  ;;  %3782 = vmatpush3.msra.mxu1 %v2739_v20 }
 0x327   : > { %3755 = vmatpush3.msra.mxu0 %v2559_v56  ;;  %3783 = vmatprep.subr.mxu1 %v4067_v0 }
 0x328   : > { %3756 = vmatprep.subr.mxu0 %v4067_v0  ;;  %3784 = vmatpush3.msra.mxu1 %v2738_v21 }
 0x329   : > { %3757 = vmatpush3.msra.mxu0 %v2558_v59  ;;  %3785 = vmatprep.subr.mxu1 %v4067_v0 }
 0x32a   : > { %v3177_v57 = vpop.f32.mrf.mxu1  ;;  %3758 = vmatprep.subr.mxu0 %v4067_v0  ;;  %3786 = vmatpush3.msra.mxu1 %v2737_v22 }
 0x32b   : > { %3759 = vmatpush3.msra.mxu0 %v2557_v4  ;;  %3787 = vmatprep.subr.mxu1 %v4067_v0 }
 0x32c   : > { %v3178_v25 = vpop.f32.mrf.mxu1  ;;  %3760 = vmatprep.subr.mxu0 %v4067_v0  ;;  %3788 = vmatpush3.msra.mxu1 %v2736_v24 }
 0x32d   : > { %v3179_v62 = vadd.f32 %v3178_v25, %v3177_v57  ;;  %3761 = vmatpush3.msra.mxu0 %v2556_v6  ;;  %3789 = vmatprep.subr.mxu1 %v4067_v0  ;;  %v2730_v25 = vld [vmem:[%s5430_s13 + $0x8] sm:$0xff] }
 0x32e   : > { %v1563_v35 = vpop.f32.mrf.mxu0  ;;  %3762 = vmatprep.subr.mxu0 %v4067_v0  ;;  %3790 = vmatpush3.msra.mxu1 %v2735_v26 }
 0x32f   : > { %v5208_v36 = vadd.f32 %v1563_v35, %v1494_v33  ;;  %3763 = vmatpush3.msra.mxu0 %v2555_v8  ;;  %3791 = vmatprep.subr.mxu1 %v4067_v0  ;;  %v2733_v35 = vld [vmem:[%s5430_s13 + $0x20] sm:$0xff] }
 0x330   : > { %v3525_v37 = vpop.f32.mrf.mxu0  ;;  %3764 = vmatprep.subr.mxu0 %v4067_v0  ;;  %3792 = vmatpush3.msra.mxu1 %v2734_v28 }
 0x331   : > { %3765 = vmatpush3.msra.mxu0 %v2554_v10  ;;  %3793 = vmatprep.subr.mxu1 %v4067_v0 }
 0x332   : > { %3766 = vmatprep.subr.mxu0 %v4067_v0  ;;  %3794 = vmatpush3.msra.mxu1 %v2733_v35 }
 0x333   : > { %3767 = vmatpush3.msra.mxu0 %v2553_v1  ;;  %3795 = vmatprep.subr.mxu1 %v4067_v0 }
 0x334   : > { %3796 = vmatpush3.msra.mxu1 %v2732_v58 }
 0x335   : > { %3797 = vmatprep.subr.mxu1 %v4067_v0 }
 0x336   : > { %3798 = vmatpush3.msra.mxu1 %v2731_v61 }
 0x337   : > { %3799 = vmatprep.subr.mxu1 %v4067_v0 }
 0x338   : > { %3800 = vmatpush3.msra.mxu1 %v2730_v25 }
 0x339   : > { %3801 = vmatprep.subr.mxu1 %v4067_v0 }
 0x34c   : > { %v3229_v23 = vpop.f32.mrf.mxu1 }
 0x34e   : > { %v3230_v27 = vpop.f32.mrf.mxu1 }
 0x34f   : > { %v3231_v29 = vadd.f32 %v3230_v27, %v3229_v23 }
 0x350   : > { %v1761_v12 = vpop.f32.mrf.mxu0 }
 0x351   : > { %v1762_v11 = vadd.f32 %v3179_v62, %v1761_v12  ;;  %v2729_v62 = vld [vmem:[%s5430_s13] sm:$0xff] }
 0x352   : > { %v3560_v14 = vpop.f32.mrf.mxu0  ;;  %3802 = vmatpush3.msra.mxu1 %v2729_v62 }
 0x353   : > { %v5303_v2 = vadd.f32 %v1762_v11, %v5208_v36  ;;  %v2726_v11 = vld [vmem:[#allocation9] sm:$0x1] }
 0x36e   : > { %v3281_v38 = vpop.f32.mrf.mxu1 }
 0x370   : > { %v3282_v39 = vpop.f32.mrf.mxu1 }
 0x371   : > { %v3283_v42 = vadd.f32 %v3282_v39, %v3281_v38 }
 0x372   : > { %v1957_v30 = vpop.f32.mrf.mxu0 }
 0x373   : > { %v1958_v31 = vadd.f32 %v3231_v29, %v1957_v30 }
 0x374   : > { %v3595_v63 = vpop.f32.mrf.mxu0 }
 0x375   : > { %v1961_v32 = vadd.f32 %v1958_v31, %v5303_v2 }
 0x390   : > { %v3333_v60 = vpop.f32.mrf.mxu1 }
 0x392   : > { %v3334_v40 = vpop.f32.mrf.mxu1 }
 0x393   : > { %v3335_v43 = vadd.f32 %v3334_v40, %v3333_v60 }
 0x394   : > { %v2153_v33 = vpop.f32.mrf.mxu0 }
 0x395   : > { %v2154_v44 = vadd.f32 %v3283_v42, %v2153_v33 }
 0x396   : > { %v3630_v34 = vpop.f32.mrf.mxu0 }
 0x397   : > { %v2157_v47 = vadd.f32 %v2154_v44, %v1961_v32 }
 0x3b2   : > { %v3385_v41 = vpop.f32.mrf.mxu1 }
 0x3b4   : > { %v2349_v36 = vpop.f32.mrf.mxu0  ;;  %v3386_v45 = vpop.f32.mrf.mxu1 }
 0x3b5   : > { %v2350_v46 = vadd.f32 %v3335_v43, %v2349_v36  ;;  %v3387_v48 = vadd.f32 %v3386_v45, %v3385_v41 }
 0x3b6   : > { %v3665_v37 = vpop.f32.mrf.mxu0 }
 0x3b7   : > { %v2353_v50 = vadd.f32 %v2350_v46, %v2157_v47 }
 0x3d4   : > { %v2545_v49 = vpop.f32.mrf.mxu0 }
 0x3d5   : > { %v2546_v51 = vadd.f32 %v3387_v48, %v2545_v49 }
 0x3d6   : > { %v3700_v53 = vpop.f32.mrf.mxu0 }
 0x3d7   : > { %v2549_v54 = vadd.f32 %v2546_v51, %v2353_v50 }
 0x3d9   : > { %v2551_v55 = vadd.f32 %v2550_v52, %v2549_v54  ;;  %v2652_v57 = vpop.f32.mrf.mxu1 }
 0x3db   : > { %v2552_v56 = vmax.f32 %v2551_v55, 0.0  ;;  %v3735_v59 = vpop.f32.mrf.mxu1 }
 0x3dd   : > { %3769 = vmatmul.mubr.f32.vlgmr.msra.gmra.mxu0 %v2552_v56 }
 0x49d   : > { %v2722_v12 = vpop.f32.mrf.mxu0 }
 0x49e   : > { %v2723_v14 = vadd.f32 %v2722_v12, %v2652_v57 }
 0x49f   : > { %v3770_v2 = vpop.f32.mrf.mxu0 }
 0x4a0   : > { %v2727_v3 = vadd.f32 %v2726_v11, %v2723_v14 }
 0x4a2   : > { %v2728_v4 = vmax.f32 %v2727_v3, 0.0 }
 0x4a4   : > { %3804 = vmatmul.mubr.f32.vlgmr.msra.gmra.mxu1 %v2728_v4 }
 0x564   : > { %v2812_v6 = vpop.f32.mrf.mxu1 }
 0x565   : > { %v2813_v7 = vadd.f32 %v2812_v6, %v2745_v5 }
 0x566   : > { %v3805_v8 = vpop.f32.mrf.mxu1 }
 0x567   : > { %2816 = vst [vmem:[%s593_s23] sm:$0x1] %v2813_v7 }
 0x568 PF: > { %s29_s18 = sadd.s32 1, %s4057_s18  }
 0x569   : > { %p26_p13 = scmp.ge.s32.totalorder %s29_s18, 4  }
 0x56b   :  { %28 = sbr.rel (!%p26_p13) target bundleno = 6 (0x6), region = 148 }
 0x570   :  { %2834 = vsyncpa [#allocation3], 1 }
 0x571   :  { %2836 = vsyncpa [#allocation3 + $0x1], 1 }
 0x572   :  { %2837 = vsyncpa [#allocation5], 1 }
 0x573   :  { %2838 = vsyncpa [#allocation8], 1 }
 0x574   :  { %2839 = vsyncpa [#allocation11], 1 }

</bundles_post_ra>
